<compile_context>
chip_gen: v5e
topology: v5e:2x2
jax: 0.10.0
libtpu: 0.0.40
codegen_flags: <defaults>
</compile_context>

<pallas_src>
import functools

import jax
import jax.numpy as jnp
from jax import lax
from jax.experimental import pallas as pl
from jax.experimental.pallas import tpu as pltpu


# ---------------------------------------------------------------------------
# Architecture (mirrors the PyTorch Discriminator.__init__)
# ---------------------------------------------------------------------------
def build_layer_configs(num_channels, conv_dim, image_size, num_extra_layers):
    """List of (cin, cout, kernel, stride, pad, leaky_relu) per conv layer."""
    assert image_size % 16 == 0, "image size must be a multiple of 16!"
    cfg = [(num_channels, conv_dim, 4, 2, 1, True)]
    conv_size = image_size // 2
    conv_depth = conv_dim
    for _ in range(num_extra_layers):
        cfg.append((conv_depth, conv_depth, 3, 1, 0, True))
    while conv_size > 4:
        cfg.append((conv_depth, conv_depth * 2, 4, 2, 1, True))
        conv_depth *= 2
        conv_size //= 2
    cfg.append((conv_depth, 1, 4, 1, 0, False))           # final conv, no act.
    return cfg


def init_params(key, cfg):
    """DCGAN-style N(0, 0.02) conv weights, HWIO layout (torch OIHW perm(2,3,1,0))."""
    keys = jax.random.split(key, len(cfg))
    return [0.02 * jax.random.normal(k, (kk, kk, cin, cout), jnp.float32)
            for k, (cin, cout, kk, _, _, _) in zip(keys, cfg)]


# ---------------------------------------------------------------------------
# Offline weight preprocessing: conv -> dense (Toeplitz) matrix
# ---------------------------------------------------------------------------
def conv_to_dense(w_hwio, hi_size, wi_size, stride, pad, channels_first_in):
    """Lower a bias-free conv to a dense matrix mapping the flattened input
    image to the flattened (ho, wo, co) output image.  Padding taps are
    dropped (exact: padded zeros contribute nothing to a bias-free conv)."""
    kh_size, kw_size, cin, cout = w_hwio.shape
    ho_size = (hi_size + 2 * pad - kh_size) // stride + 1
    wo_size = (wi_size + 2 * pad - kw_size) // stride + 1
    rin = hi_size * wi_size * cin
    rout = ho_size * wo_size * cout
    dense = jnp.zeros((rin, rout), jnp.float32)

    ho = jnp.arange(ho_size)[:, None, None, None]
    wo = jnp.arange(wo_size)[None, :, None, None]
    ci = jnp.arange(cin)[None, None, :, None]
    co = jnp.arange(cout)[None, None, None, :]
    full = (ho_size, wo_size, cin, cout)

    for kh in range(kh_size):
        for kw in range(kw_size):
            hi = ho * stride - pad + kh
            wi = wo * stride - pad + kw
            valid = (hi >= 0) & (hi < hi_size) & (wi >= 0) & (wi < wi_size)
            hic = jnp.clip(hi, 0, hi_size - 1)
            wic = jnp.clip(wi, 0, wi_size - 1)
            if channels_first_in:                      # rows follow NCHW flat
                rows = (ci * hi_size + hic) * wi_size + wic
            else:                                      # rows follow NHWC flat
                rows = (hic * wi_size + wic) * cin + ci
            cols = (ho * wo_size + wo) * cout + co
            vals = jnp.where(valid, w_hwio[kh, kw][None, None, :, :], 0.0)
            dense = dense.at[jnp.broadcast_to(rows, full),
                             jnp.broadcast_to(cols, full)].add(
                                 jnp.broadcast_to(vals, full))
    return dense, ho_size


def build_dense_weights(weights_hwio, cfg, image_size):
    """One dense matrix per conv layer (done once; pure weight preprocessing)."""
    h = image_size
    mats = []
    for idx, (w, (_, _, k, s, p, _)) in enumerate(zip(weights_hwio, cfg)):
        dense, h = conv_to_dense(w, h, h, s, p, channels_first_in=(idx == 0))
        mats.append(dense)
    return mats


# ---------------------------------------------------------------------------
# Fused Pallas kernel: all layers + LeakyReLU + batch mean in one call
# ---------------------------------------------------------------------------
def _fused_conv_stack_mean_kernel(*refs, lrelu_flags, neg_slope, inv_batch):
    x_ref, *w_refs, o_ref = refs
    h = x_ref[...]                                     # (N, Hi*Wi*Cin) in VMEM
    for w_ref, do_lrelu in zip(w_refs, lrelu_flags):
        h = jnp.dot(h.astype(w_ref.dtype), w_ref[...],
                    preferred_element_type=jnp.float32)
        if do_lrelu:
            h = jnp.where(h >= 0.0, h, neg_slope * h)  # LeakyReLU(0.2) on f32 acc
    # out.mean(0): fold the batch mean into the epilogue (sublane reduce * 1/N).
    o_ref[...] = (jnp.sum(h, axis=0, keepdims=True) * inv_batch).astype(o_ref.dtype)


def discriminator_forward_fused(x_nchw, dense_mats, lrelu_flags, *,
                                neg_slope=0.2, compute_dtype=jnp.float32):
    n = x_nchw.shape[0]
    x2d = x_nchw.reshape(n, -1).astype(compute_dtype)  # NCHW flat (free reshape)
    mats = [m.astype(compute_dtype) for m in dense_mats]
    p_out = mats[-1].shape[1]
    assert p_out == 1, "final conv must reduce to a single element (view(1))"

    kernel = functools.partial(
        _fused_conv_stack_mean_kernel,
        lrelu_flags=tuple(lrelu_flags), neg_slope=neg_slope, inv_batch=1.0 / n)

    in_specs = [pl.BlockSpec(x2d.shape, lambda i: (0, 0))]
    in_specs += [pl.BlockSpec(m.shape, lambda i: (0, 0)) for m in mats]

    out = pl.pallas_call(
        kernel,
        out_shape=jax.ShapeDtypeStruct((1, p_out), jnp.float32),
        grid=(1,),                                     # everything fits in VMEM
        in_specs=in_specs,
        out_specs=pl.BlockSpec((1, p_out), lambda i: (0, 0)),
        compiler_params=pltpu.CompilerParams(
            dimension_semantics=("arbitrary",)),
    )(x2d, *mats)
    return out.reshape(p_out)


# ---------------------------------------------------------------------------
# Pure-JAX reference (lax.conv) for correctness checking
# ---------------------------------------------------------------------------
def discriminator_reference(x_nchw, weights_hwio, cfg):
    y = jnp.transpose(x_nchw, (0, 2, 3, 1))            # NCHW -> NHWC
    for w, (_, _, _, s, p, lrelu) in zip(weights_hwio, cfg):
        y = lax.conv_general_dilated(
            y, w, (s, s), [(p, p), (p, p)],
            dimension_numbers=("NHWC", "HWIO", "NHWC"))
        if lrelu:
            y = jnp.where(y >= 0, y, 0.2 * y)
    return jnp.mean(y, axis=0).reshape(1)


if __name__ == "__main__":
    key = jax.random.PRNGKey(0)
    k_x, k_p = jax.random.split(key)

    batch, num_channels, image_size, conv_dim = 2, 4, 16, 8
    num_extra_layers = 0

    x = jax.random.normal(
        k_x, (batch, num_channels, image_size, image_size), jnp.float32)
    cfg = build_layer_configs(num_channels, conv_dim, image_size, num_extra_layers)
    params = init_params(k_p, cfg)
    lrelu_flags = [c[5] for c in cfg]

    # One-time weight preprocessing (conv -> dense matrices).
    dense_mats = build_dense_weights(params, cfg, image_size)

    ref = jax.block_until_ready(discriminator_reference(x, params, cfg))

    # f32 path: tight check against the lax.conv reference.
    out_f32 = jax.block_until_ready(
        discriminator_forward_fused(x, dense_mats, lrelu_flags,
                                    compute_dtype=jnp.float32))
    assert out_f32.shape == (1,), out_f32.shape
    assert jnp.allclose(out_f32, ref, atol=1e-5, rtol=1e-4), (out_f32, ref)

    # bf16 operands (f32 accumulation): same kernel, loose tolerance vs f32 ref.
    out_bf16 = jax.block_until_ready(
        discriminator_forward_fused(x, dense_mats, lrelu_flags,
                                    compute_dtype=jnp.bfloat16))
    assert out_bf16.shape == (1,), out_bf16.shape
    assert jnp.allclose(out_bf16, ref, atol=5e-3), (out_bf16, ref)

    print("KERNEL_OK")
</pallas_src>

<mosaic_0001>
module attributes {stable_mosaic.version = 11 : i64} {
  func.func @_fused_conv_stack_mean_kernel(%arg0: i32, %arg1: memref<2x1024xf32, #tpu.memory_space<vmem>>, %arg2: memref<1024x512xf32, #tpu.memory_space<vmem>>, %arg3: memref<512x256xf32, #tpu.memory_space<vmem>>, %arg4: memref<256x1xf32, #tpu.memory_space<vmem>>, %arg5: memref<1x1xf32, #tpu.memory_space<vmem>>) attributes {dimension_semantics = [#tpu.dimension_semantics<arbitrary>], iteration_bounds = array<i64: 1>, scalar_prefetch = 0 : i64, scratch_operands = 0 : i64, tpu.core_type = #tpu.core_type<tc>, window_params = [{pipeline_mode = #tpu.pipeline_mode<synchronous>, transform_indices = @transform_0, window_bounds = array<i64: 2, 1024>}, {pipeline_mode = #tpu.pipeline_mode<synchronous>, transform_indices = @transform_1, window_bounds = array<i64: 1024, 512>}, {pipeline_mode = #tpu.pipeline_mode<synchronous>, transform_indices = @transform_2, window_bounds = array<i64: 512, 256>}, {pipeline_mode = #tpu.pipeline_mode<synchronous>, transform_indices = @transform_3, window_bounds = array<i64: 256, 1>}, {pipeline_mode = #tpu.pipeline_mode<synchronous>, transform_indices = @transform_4, window_bounds = array<i64: 1, 1>}]} {
    %c0 = arith.constant 0 : index
    %c0_0 = arith.constant 0 : index
    %0 = vector.load %arg1[%c0, %c0_0] : memref<2x1024xf32, #tpu.memory_space<vmem>>, vector<2x1024xf32>
    %c0_1 = arith.constant 0 : index
    %c0_2 = arith.constant 0 : index
    %1 = vector.load %arg2[%c0_1, %c0_2] : memref<1024x512xf32, #tpu.memory_space<vmem>>, vector<1024x512xf32>
    %cst = arith.constant dense<0.000000e+00> : vector<2x512xf32>
    %2 = tpu.matmul %0, %1, %cst {dimension_numbers = #tpu.dot_dimension_numbers<[1], [0], [0], [1], [0, 0, 1, 1], [], []>} : vector<2x1024xf32>, vector<1024x512xf32>, vector<2x512xf32> -> vector<2x512xf32>
    %cst_3 = arith.constant 0.000000e+00 : f32
    %3 = vector.broadcast %cst_3 : f32 to vector<2x512xf32>
    %4 = arith.cmpf oge, %2, %3 : vector<2x512xf32>
    %cst_4 = arith.constant 2.000000e-01 : f32
    %5 = vector.broadcast %cst_4 : f32 to vector<2x512xf32>
    %6 = arith.mulf %5, %2 : vector<2x512xf32>
    %7 = arith.select %4, %2, %6 : vector<2x512xi1>, vector<2x512xf32>
    %c0_5 = arith.constant 0 : index
    %c0_6 = arith.constant 0 : index
    %8 = vector.load %arg3[%c0_5, %c0_6] : memref<512x256xf32, #tpu.memory_space<vmem>>, vector<512x256xf32>
    %cst_7 = arith.constant dense<0.000000e+00> : vector<2x256xf32>
    %9 = tpu.matmul %7, %8, %cst_7 {dimension_numbers = #tpu.dot_dimension_numbers<[1], [0], [0], [1], [0, 0, 1, 1], [], []>} : vector<2x512xf32>, vector<512x256xf32>, vector<2x256xf32> -> vector<2x256xf32>
    %cst_8 = arith.constant 0.000000e+00 : f32
    %10 = vector.broadcast %cst_8 : f32 to vector<2x256xf32>
    %11 = arith.cmpf oge, %9, %10 : vector<2x256xf32>
    %cst_9 = arith.constant 2.000000e-01 : f32
    %12 = vector.broadcast %cst_9 : f32 to vector<2x256xf32>
    %13 = arith.mulf %12, %9 : vector<2x256xf32>
    %14 = arith.select %11, %9, %13 : vector<2x256xi1>, vector<2x256xf32>
    %c0_10 = arith.constant 0 : index
    %c0_11 = arith.constant 0 : index
    %15 = vector.load %arg4[%c0_10, %c0_11] : memref<256x1xf32, #tpu.memory_space<vmem>>, vector<256x1xf32>
    %cst_12 = arith.constant dense<0.000000e+00> : vector<2x1xf32>
    %16 = tpu.matmul %14, %15, %cst_12 {dimension_numbers = #tpu.dot_dimension_numbers<[1], [0], [0], [1], [0, 0, 1, 1], [], []>} : vector<2x256xf32>, vector<256x1xf32>, vector<2x1xf32> -> vector<2x1xf32>
    %cst_13 = arith.constant dense<0.000000e+00> : vector<1xf32>
    %17 = vector.multi_reduction <add>, %16, %cst_13 [0] : vector<2x1xf32> to vector<1xf32>
    %18 = vector.shape_cast %17 : vector<1xf32> to vector<1x1xf32>
    %cst_14 = arith.constant 5.000000e-01 : f32
    %19 = vector.broadcast %cst_14 : f32 to vector<1x1xf32>
    %20 = arith.mulf %18, %19 : vector<1x1xf32>
    %c0_15 = arith.constant 0 : index
    %c0_16 = arith.constant 0 : index
    %21 = vector.load %arg5[%c0_15, %c0_16] : memref<1x1xf32, #tpu.memory_space<vmem>>, vector<1x1xf32>
    tpu.vector_store %arg5[%c0_15, %c0_16], %20 {strides = array<i32>} : memref<1x1xf32, #tpu.memory_space<vmem>>, vector<1x1xf32>,
    return
  }
  func.func @transform_0(%arg0: i32) -> (i32, i32) {
    %c0_i32 = arith.constant 0 : i32
    %c0_i32_0 = arith.constant 0 : i32
    %c0_i32_1 = arith.constant 0 : i32
    return %c0_i32, %c0_i32_0 : i32, i32
  }
  func.func @transform_1(%arg0: i32) -> (i32, i32) {
    %c0_i32 = arith.constant 0 : i32
    %c0_i32_0 = arith.constant 0 : i32
    %c0_i32_1 = arith.constant 0 : i32
    return %c0_i32, %c0_i32_0 : i32, i32
  }
  func.func @transform_2(%arg0: i32) -> (i32, i32) {
    %c0_i32 = arith.constant 0 : i32
    %c0_i32_0 = arith.constant 0 : i32
    %c0_i32_1 = arith.constant 0 : i32
    return %c0_i32, %c0_i32_0 : i32, i32
  }
  func.func @transform_3(%arg0: i32) -> (i32, i32) {
    %c0_i32 = arith.constant 0 : i32
    %c0_i32_0 = arith.constant 0 : i32
    %c0_i32_1 = arith.constant 0 : i32
    return %c0_i32, %c0_i32_0 : i32, i32
  }
  func.func @transform_4(%arg0: i32) -> (i32, i32) {
    %c0_i32 = arith.constant 0 : i32
    %c0_i32_0 = arith.constant 0 : i32
    %c0_i32_1 = arith.constant 0 : i32
    return %c0_i32, %c0_i32_0 : i32, i32
  }
}

</mosaic_0001>

<bundles_post_ra>
// kernel: tpu_custom_call.1
= control target key start
LH: loop header
LB: loop body
LE: loop exit
PB: predicated region body
PF: predicated region fallthrough
CT: control target
= control target key end

     0   :  { %9 = vsyncpa [#allocation3], 0  ;;  %s2000_s0 = inlined_call_operand.hbm [shape: f32[2,1024], index: 0, kind: input, shape index: {}]   ;;  %s2001_s1 = inlined_call_operand.hbm [shape: f32[1024,512], index: 1, kind: input, shape index: {}]   ;;  %s2002_s2 = inlined_call_operand.hbm [shape: f32[512,256], index: 2, kind: input, shape index: {}]   ;;  %s2003_s3 = inlined_call_operand.vmem [shape: f32[256,1], index: 3, kind: input, shape index: {}]   ;;  %s2004_s4 = inlined_call_operand.hbm [shape: f32[1,1], index: 4, kind: output, shape index: {}]  }
   0x1   :  { %10 = vsyncpa [#allocation6], 0  ;;  %s27_s17 = sshll.u32 %s2001_s1, 4  ;;  %s28_s17 = int_to_ptr.hbm [resolvable:$true] %s27_s17 }
   0x2   :  { %11 = vsyncpa [#allocation4], 0  ;;  %s1763_s18 = smov [#allocation5]   ;;  %s17_s22 = sshll.u32 %s2000_s0, 4  ;;  %s18_s22 = int_to_ptr.hbm [resolvable:$true] %s17_s22 }
   0x3   :  { %s29_s19 = sshll.u32 %s1763_s18, 4  ;;  %s1764_s23 = smov 512   ;;  %s30_s19 = int_to_ptr.vmem [resolvable:$true] %s29_s19 }
   0x4   :  { %s1765_s24 = smov 32   ;;  %s1766_s25 = smov [#allocation2]  }
   0x5   :  { %35 = dma.hbm_to_vmem [thread:$0]  %s28_s17, 65536, %s30_s19, [#allocation6], %s1764_s23, %s1764_s23, %s1765_s24  }
   0x6   :  { %s19_s26 = sshll.u32 %s1766_s25, 4  ;;  %s40_s29 = sshll.u32 %s2002_s2, 4  ;;  %s20_s26 = int_to_ptr.vmem [resolvable:$true] %s19_s26  ;;  %s41_s29 = int_to_ptr.hbm [resolvable:$true] %s40_s29 }
   0x7   :  { %22 = dma.hbm_to_vmem [thread:$0]  %s18_s22, 256, %s20_s26, [#allocation3]  }
   0x8   :  { %s1767_s1 = smov [#allocation7]   ;;  %s1768_s5 = smov 256  }
   0x9   :  { %s42_s30 = sshll.u32 %s1767_s1, 4  ;;  %s1769_s6 = smov 16   ;;  %s43_s30 = int_to_ptr.vmem [resolvable:$true] %s42_s30 }
   0xa   :  { %48 = dma.hbm_to_vmem [thread:$0]  %s41_s29, 16384, %s43_s30, [#allocation6], %s1768_s5, %s1768_s5, %s1769_s6  }
   0xb   :  { %1757 = dma.done.wait [#allocation3], 256  }
   0xc   :  { %1758 = vsyncadd [#allocation3], 4294967040 }
   0xd   :  { %1759 = dma.done.wait [#allocation6], 81920  }
   0xe   :  { %1760 = vsyncadd [#allocation6], 4294885376  ;;  %v125_v0 = vld [vmem:[#allocation5 + $0x1e0] sm:$0xff]  ;;  %vm1616_vm6 = vcmask 1024   ;;  %s1634_s14 = sshll.u32 %s2004_s4, 4  ;;  %vm1625_vm7 = vcmask 0   ;;  %s1635_s14 = int_to_ptr.hbm [resolvable:$true] %s1634_s14 }
   0xf   :  { %v189_v1 = vld [vmem:[#allocation5 + $0x3e0] sm:$0xff]  ;;  %598 = vmatpush.msra.mxu0 %v125_v0 }
  0x10   :  { %v253_v2 = vld [vmem:[#allocation5 + $0x5e0] sm:$0xff]  ;;  %618 = vmatpush.msra.mxu1 %v189_v1 }
  0x11   :  { %v121_v3 = vld [vmem:[#allocation5 + $0x1c0] sm:$0xff]  ;;  %638 = vmatpush.msra.mxu2 %v253_v2 }
  0x12   :  { %v185_v4 = vld [vmem:[#allocation5 + $0x3c0] sm:$0xff]  ;;  %599 = vmatpush.msra.mxu0 %v121_v3 }
  0x13   :  { %v249_v5 = vld [vmem:[#allocation5 + $0x5c0] sm:$0xff]  ;;  %619 = vmatpush.msra.mxu1 %v185_v4 }
  0x14   :  { %v317_v6 = vld [vmem:[#allocation5 + $0x7e0] sm:$0xff]  ;;  %639 = vmatpush.msra.mxu2 %v249_v5 }
  0x15   :  { %v117_v7 = vld [vmem:[#allocation5 + $0x1a0] sm:$0xff]  ;;  %658 = vmatpush.msra.mxu3 %v317_v6 }
  0x16   :  { %v181_v8 = vld [vmem:[#allocation5 + $0x3a0] sm:$0xff]  ;;  %600 = vmatpush.msra.mxu0 %v117_v7 }
  0x17   :  { %v245_v9 = vld [vmem:[#allocation5 + $0x5a0] sm:$0xff]  ;;  %620 = vmatpush.msra.mxu1 %v181_v8 }
  0x18   :  { %v313_v10 = vld [vmem:[#allocation5 + $0x7c0] sm:$0xff]  ;;  %640 = vmatpush.msra.mxu2 %v245_v9 }
  0x19   :  { %v113_v11 = vld [vmem:[#allocation5 + $0x180] sm:$0xff]  ;;  %659 = vmatpush.msra.mxu3 %v313_v10 }
  0x1a   :  { %v177_v12 = vld [vmem:[#allocation5 + $0x380] sm:$0xff]  ;;  %601 = vmatpush.msra.mxu0 %v113_v11 }
  0x1b   :  { %v241_v13 = vld [vmem:[#allocation5 + $0x580] sm:$0xff]  ;;  %621 = vmatpush.msra.mxu1 %v177_v12 }
  0x1c   :  { %v309_v14 = vld [vmem:[#allocation5 + $0x7a0] sm:$0xff]  ;;  %641 = vmatpush.msra.mxu2 %v241_v13 }
  0x1d   :  { %v109_v15 = vld [vmem:[#allocation5 + $0x160] sm:$0xff]  ;;  %660 = vmatpush.msra.mxu3 %v309_v14 }
  0x1e   :  { %v173_v16 = vld [vmem:[#allocation5 + $0x360] sm:$0xff]  ;;  %602 = vmatpush.msra.mxu0 %v109_v15 }
  0x1f   :  { %v237_v17 = vld [vmem:[#allocation5 + $0x560] sm:$0xff]  ;;  %622 = vmatpush.msra.mxu1 %v173_v16 }
  0x20   :  { %v305_v18 = vld [vmem:[#allocation5 + $0x780] sm:$0xff]  ;;  %642 = vmatpush.msra.mxu2 %v237_v17 }
  0x21   :  { %v105_v19 = vld [vmem:[#allocation5 + $0x140] sm:$0xff]  ;;  %661 = vmatpush.msra.mxu3 %v305_v18 }
  0x22   :  { %v169_v20 = vld [vmem:[#allocation5 + $0x340] sm:$0xff]  ;;  %603 = vmatpush.msra.mxu0 %v105_v19  ;;  %v63_v19 = vld [vmem:[#allocation2] sm:$0xff] }
  0x23   :  { %v233_v21 = vld [vmem:[#allocation5 + $0x540] sm:$0xff]  ;;  %623 = vmatpush.msra.mxu1 %v169_v20  ;;  %579 = vst [vmem:[#allocation1] ss:$4 sm:$0xff] %v63_v19 }
  0x24   :  { %v301_v22 = vld [vmem:[#allocation5 + $0x760] sm:$0xff]  ;;  %643 = vmatpush.msra.mxu2 %v233_v21 }
  0x25   :  { %v101_v23 = vld [vmem:[#allocation5 + $0x120] sm:$0xff]  ;;  %662 = vmatpush.msra.mxu3 %v301_v22 }
  0x26   :  { %v165_v24 = vld [vmem:[#allocation5 + $0x320] sm:$0xff]  ;;  %604 = vmatpush.msra.mxu0 %v101_v23 }
  0x27   :  { %v229_v25 = vld [vmem:[#allocation5 + $0x520] sm:$0xff]  ;;  %624 = vmatpush.msra.mxu1 %v165_v24 }
  0x28   :  { %v297_v26 = vld [vmem:[#allocation5 + $0x740] sm:$0xff]  ;;  %644 = vmatpush.msra.mxu2 %v229_v25 }
  0x29   :  { %v97_v27 = vld [vmem:[#allocation5 + $0x100] sm:$0xff]  ;;  %663 = vmatpush.msra.mxu3 %v297_v26 }
  0x2a   :  { %v161_v28 = vld [vmem:[#allocation5 + $0x300] sm:$0xff]  ;;  %605 = vmatpush.msra.mxu0 %v97_v27 }
  0x2b   :  { %v225_v29 = vld [vmem:[#allocation5 + $0x500] sm:$0xff]  ;;  %625 = vmatpush.msra.mxu1 %v161_v28 }
  0x2c   :  { %v293_v30 = vld [vmem:[#allocation5 + $0x720] sm:$0xff]  ;;  %645 = vmatpush.msra.mxu2 %v225_v29 }
  0x2d   :  { %v93_v31 = vld [vmem:[#allocation5 + $0xe0] sm:$0xff]  ;;  %664 = vmatpush.msra.mxu3 %v293_v30 }
  0x2e   :  { %v157_v32 = vld [vmem:[#allocation5 + $0x2e0] sm:$0xff]  ;;  %606 = vmatpush.msra.mxu0 %v93_v31 }
  0x2f   :  { %v221_v33 = vld [vmem:[#allocation5 + $0x4e0] sm:$0xff]  ;;  %626 = vmatpush.msra.mxu1 %v157_v32  ;;  %v64_v32 = vld [vmem:[#allocation2 + $0x8] sm:$0xff] }
  0x30   :  { %v289_v34 = vld [vmem:[#allocation5 + $0x700] sm:$0xff]  ;;  %646 = vmatpush.msra.mxu2 %v221_v33  ;;  %581 = vst [vmem:[#allocation1 + $0x20] ss:$4 sm:$0xff] %v64_v32  ;;  %v302_v32 = vld [vmem:[#allocation5 + $0x768] sm:$0xff] }
  0x31   :  { %v89_v35 = vld [vmem:[#allocation5 + $0xc0] sm:$0xff]  ;;  %665 = vmatpush.msra.mxu3 %v289_v34 }
  0x32   :  { %v153_v36 = vld [vmem:[#allocation5 + $0x2c0] sm:$0xff]  ;;  %607 = vmatpush.msra.mxu0 %v89_v35 }
  0x33   :  { %v217_v37 = vld [vmem:[#allocation5 + $0x4c0] sm:$0xff]  ;;  %627 = vmatpush.msra.mxu1 %v153_v36 }
  0x34   :  { %v285_v38 = vld [vmem:[#allocation5 + $0x6e0] sm:$0xff]  ;;  %647 = vmatpush.msra.mxu2 %v217_v37 }
  0x35   :  { %v85_v39 = vld [vmem:[#allocation5 + $0xa0] sm:$0xff]  ;;  %666 = vmatpush.msra.mxu3 %v285_v38 }
  0x36   :  { %v149_v40 = vld [vmem:[#allocation5 + $0x2a0] sm:$0xff]  ;;  %608 = vmatpush.msra.mxu0 %v85_v39 }
  0x37   :  { %v213_v41 = vld [vmem:[#allocation5 + $0x4a0] sm:$0xff]  ;;  %628 = vmatpush.msra.mxu1 %v149_v40 }
  0x38   :  { %v281_v42 = vld [vmem:[#allocation5 + $0x6c0] sm:$0xff]  ;;  %648 = vmatpush.msra.mxu2 %v213_v41 }
  0x39   :  { %v81_v43 = vld [vmem:[#allocation5 + $0x80] sm:$0xff]  ;;  %667 = vmatpush.msra.mxu3 %v281_v42 }
  0x3a   :  { %v145_v44 = vld [vmem:[#allocation5 + $0x280] sm:$0xff]  ;;  %609 = vmatpush.msra.mxu0 %v81_v43 }
  0x3b   :  { %v209_v45 = vld [vmem:[#allocation5 + $0x480] sm:$0xff]  ;;  %629 = vmatpush.msra.mxu1 %v145_v44 }
  0x3c   :  { %v277_v46 = vld [vmem:[#allocation5 + $0x6a0] sm:$0xff]  ;;  %649 = vmatpush.msra.mxu2 %v209_v45 }
  0x3d   :  { %v77_v47 = vld [vmem:[#allocation5 + $0x60] sm:$0xff]  ;;  %668 = vmatpush.msra.mxu3 %v277_v46 }
  0x3e   :  { %v141_v48 = vld [vmem:[#allocation5 + $0x260] sm:$0xff]  ;;  %610 = vmatpush.msra.mxu0 %v77_v47 }
  0x3f   :  { %v205_v49 = vld [vmem:[#allocation5 + $0x460] sm:$0xff]  ;;  %630 = vmatpush.msra.mxu1 %v141_v48 }
  0x40   :  { %v273_v50 = vld [vmem:[#allocation5 + $0x680] sm:$0xff]  ;;  %650 = vmatpush.msra.mxu2 %v205_v49 }
  0x41   :  { %v73_v51 = vld [vmem:[#allocation5 + $0x40] sm:$0xff]  ;;  %669 = vmatpush.msra.mxu3 %v273_v50 }
  0x42   :  { %v137_v52 = vld [vmem:[#allocation5 + $0x240] sm:$0xff]  ;;  %611 = vmatpush.msra.mxu0 %v73_v51 }
  0x43   :  { %v201_v53 = vld [vmem:[#allocation5 + $0x440] sm:$0xff]  ;;  %631 = vmatpush.msra.mxu1 %v137_v52 }
  0x44   :  { %v269_v54 = vld [vmem:[#allocation5 + $0x660] sm:$0xff]  ;;  %651 = vmatpush.msra.mxu2 %v201_v53 }
  0x45   :  { %v69_v55 = vld [vmem:[#allocation5 + $0x20] sm:$0xff]  ;;  %670 = vmatpush.msra.mxu3 %v269_v54 }
  0x46   :  { %v133_v56 = vld [vmem:[#allocation5 + $0x220] sm:$0xff]  ;;  %612 = vmatpush.msra.mxu0 %v69_v55 }
  0x47   :  { %v197_v57 = vld [vmem:[#allocation5 + $0x420] sm:$0xff]  ;;  %632 = vmatpush.msra.mxu1 %v133_v56 }
  0x48   :  { %v265_v58 = vld [vmem:[#allocation5 + $0x640] sm:$0xff]  ;;  %652 = vmatpush.msra.mxu2 %v197_v57  ;;  %v1805_v57 = vld.sshfl [vmem:[#allocation1 + $0x10] sm:$0xff pattern:$0x73625140] }
  0x49   :  { %v65_v59 = vld [vmem:[#allocation5] sm:$0xff]  ;;  %671 = vmatpush.msra.mxu3 %v265_v58 }
  0x4a   :  { %v129_v60 = vld [vmem:[#allocation5 + $0x200] sm:$0xff]  ;;  %613 = vmatpush.msra.mxu0 %v65_v59 }
  0x4b   :  { %v193_v61 = vld [vmem:[#allocation5 + $0x400] sm:$0xff]  ;;  %633 = vmatpush.msra.mxu1 %v129_v60 }
  0x4c   :  { %v261_v62 = vld [vmem:[#allocation5 + $0x620] sm:$0xff]  ;;  %653 = vmatpush.msra.mxu2 %v193_v61 }
  0x4d   :  { %v381_v63 = vld [vmem:[#allocation5 + $0x9e0] sm:$0xff]  ;;  %672 = vmatpush.msra.mxu3 %v261_v62  ;;  %v1807_v62 = vld.sshfl [vmem:[#allocation1] sm:$0xff pattern:$0x73625140]  ;;  %654 = vmatmul.f32.vlgmr.msra.gmra.mxu2 %v1805_v57 }
  0x4e   :  { %v445_v0 = vld [vmem:[#allocation5 + $0xbe0] sm:$0xff]  ;;  %678 = vmatpush.msrb.mxu0 %v381_v63 }
  0x4f   :  { %v509_v1 = vld [vmem:[#allocation5 + $0xde0] sm:$0xff]  ;;  %698 = vmatpush.msrb.mxu1 %v445_v0  ;;  %614 = vmatmul.f32.vlgmr.msra.gmra.mxu0 %v1807_v62 }
  0x50   :  { %v257_v2 = vld [vmem:[#allocation5 + $0x600] sm:$0xff]  ;;  %718 = vmatpush.msrb.mxu2 %v509_v1 }
  0x51   :  { %v377_v3 = vld [vmem:[#allocation5 + $0x9c0] sm:$0xff]  ;;  %673 = vmatpush.msra.mxu3 %v257_v2 }
  0x52   :  { %v441_v4 = vld [vmem:[#allocation5 + $0xbc0] sm:$0xff]  ;;  %679 = vmatpush.msrb.mxu0 %v377_v3 }
  0x53   :  { %v505_v5 = vld [vmem:[#allocation5 + $0xdc0] sm:$0xff]  ;;  %699 = vmatpush.msrb.mxu1 %v441_v4  ;;  %v1813_v4 = vld.sshfl [vmem:[#allocation1 + $0x8] sm:$0xff pattern:$0x73625140] }
  0x54   :  { %v573_v6 = vld [vmem:[#allocation5 + $0xfe0] sm:$0xff]  ;;  %719 = vmatpush.msrb.mxu2 %v505_v5  ;;  %v126_v5 = vld [vmem:[#allocation5 + $0x1e8] sm:$0xff]  ;;  %634 = vmatmul.f32.vlgmr.msra.gmra.mxu1 %v1813_v4 }
  0x55   :  { %v373_v7 = vld [vmem:[#allocation5 + $0x9a0] sm:$0xff]  ;;  %738 = vmatpush.msrb.mxu3 %v573_v6  ;;  %v190_v6 = vld [vmem:[#allocation5 + $0x3e8] sm:$0xff] }
  0x56   :  { %v437_v8 = vld [vmem:[#allocation5 + $0xba0] sm:$0xff]  ;;  %680 = vmatpush.msrb.mxu0 %v373_v7  ;;  %v254_v7 = vld [vmem:[#allocation5 + $0x5e8] sm:$0xff] }
  0x57   :  { %v501_v9 = vld [vmem:[#allocation5 + $0xda0] sm:$0xff]  ;;  %700 = vmatpush.msrb.mxu1 %v437_v8 }
  0x58   :  { %v569_v10 = vld [vmem:[#allocation5 + $0xfc0] sm:$0xff]  ;;  %720 = vmatpush.msrb.mxu2 %v501_v9  ;;  %v122_v9 = vld [vmem:[#allocation5 + $0x1c8] sm:$0xff] }
  0x59   :  { %v369_v11 = vld [vmem:[#allocation5 + $0x980] sm:$0xff]  ;;  %739 = vmatpush.msrb.mxu3 %v569_v10  ;;  %v186_v10 = vld [vmem:[#allocation5 + $0x3c8] sm:$0xff] }
  0x5a   :  { %v433_v12 = vld [vmem:[#allocation5 + $0xb80] sm:$0xff]  ;;  %681 = vmatpush.msrb.mxu0 %v369_v11  ;;  %v250_v11 = vld [vmem:[#allocation5 + $0x5c8] sm:$0xff] }
  0x5b   :  { %v497_v13 = vld [vmem:[#allocation5 + $0xd80] sm:$0xff]  ;;  %701 = vmatpush.msrb.mxu1 %v433_v12  ;;  %v318_v12 = vld [vmem:[#allocation5 + $0x7e8] sm:$0xff] }
  0x5c   :  { %v565_v14 = vld [vmem:[#allocation5 + $0xfa0] sm:$0xff]  ;;  %721 = vmatpush.msrb.mxu2 %v497_v13  ;;  %v1817_v13 = vld.sshfl [vmem:[#allocation1 + $0x30] sm:$0xff pattern:$0x73625140] }
  0x5d   :  { %v365_v15 = vld [vmem:[#allocation5 + $0x960] sm:$0xff]  ;;  %740 = vmatpush.msrb.mxu3 %v565_v14  ;;  %v118_v14 = vld [vmem:[#allocation5 + $0x1a8] sm:$0xff] }
  0x5e   :  { %v429_v16 = vld [vmem:[#allocation5 + $0xb60] sm:$0xff]  ;;  %682 = vmatpush.msrb.mxu0 %v365_v15  ;;  %v182_v15 = vld [vmem:[#allocation5 + $0x3a8] sm:$0xff] }
  0x5f   :  { %v493_v17 = vld [vmem:[#allocation5 + $0xd60] sm:$0xff]  ;;  %702 = vmatpush.msrb.mxu1 %v429_v16  ;;  %v246_v16 = vld [vmem:[#allocation5 + $0x5a8] sm:$0xff] }
  0x60   :  { %v561_v18 = vld [vmem:[#allocation5 + $0xf80] sm:$0xff]  ;;  %722 = vmatpush.msrb.mxu2 %v493_v17  ;;  %v314_v17 = vld [vmem:[#allocation5 + $0x7c8] sm:$0xff] }
  0x61   :  { %v361_v20 = vld [vmem:[#allocation5 + $0x940] sm:$0xff]  ;;  %741 = vmatpush.msrb.mxu3 %v561_v18  ;;  %v1819_v18 = vld.sshfl [vmem:[#allocation1 + $0x20] sm:$0xff pattern:$0x73625140] }
  0x62   :  { %v425_v21 = vld [vmem:[#allocation5 + $0xb40] sm:$0xff]  ;;  %683 = vmatpush.msrb.mxu0 %v361_v20  ;;  %v114_v20 = vld [vmem:[#allocation5 + $0x188] sm:$0xff] }
  0x63   :  { %v489_v22 = vld [vmem:[#allocation5 + $0xd40] sm:$0xff]  ;;  %703 = vmatpush.msrb.mxu1 %v425_v21  ;;  %v178_v21 = vld [vmem:[#allocation5 + $0x388] sm:$0xff] }
  0x64   :  { %v557_v23 = vld [vmem:[#allocation5 + $0xf60] sm:$0xff]  ;;  %723 = vmatpush.msrb.mxu2 %v489_v22  ;;  %v242_v22 = vld [vmem:[#allocation5 + $0x588] sm:$0xff] }
  0x65   :  { %v357_v24 = vld [vmem:[#allocation5 + $0x920] sm:$0xff]  ;;  %742 = vmatpush.msrb.mxu3 %v557_v23  ;;  %v310_v23 = vld [vmem:[#allocation5 + $0x7a8] sm:$0xff] }
  0x66   :  { %v421_v25 = vld [vmem:[#allocation5 + $0xb20] sm:$0xff]  ;;  %684 = vmatpush.msrb.mxu0 %v357_v24  ;;  %v1825_v24 = vld.sshfl [vmem:[#allocation1 + $0x28] sm:$0xff pattern:$0x73625140] }
  0x67   :  { %v485_v26 = vld [vmem:[#allocation5 + $0xd20] sm:$0xff]  ;;  %704 = vmatpush.msrb.mxu1 %v421_v25  ;;  %v110_v25 = vld [vmem:[#allocation5 + $0x168] sm:$0xff] }
  0x68   :  { %v553_v27 = vld [vmem:[#allocation5 + $0xf40] sm:$0xff]  ;;  %724 = vmatpush.msrb.mxu2 %v485_v26  ;;  %v174_v26 = vld [vmem:[#allocation5 + $0x368] sm:$0xff] }
  0x69   :  { %v353_v28 = vld [vmem:[#allocation5 + $0x900] sm:$0xff]  ;;  %743 = vmatpush.msrb.mxu3 %v553_v27  ;;  %v238_v27 = vld [vmem:[#allocation5 + $0x568] sm:$0xff] }
  0x6a   :  { %v417_v29 = vld [vmem:[#allocation5 + $0xb00] sm:$0xff]  ;;  %685 = vmatpush.msrb.mxu0 %v353_v28  ;;  %v306_v28 = vld [vmem:[#allocation5 + $0x788] sm:$0xff] }
  0x6b   :  { %v481_v30 = vld [vmem:[#allocation5 + $0xd00] sm:$0xff]  ;;  %705 = vmatpush.msrb.mxu1 %v417_v29  ;;  %v106_v29 = vld [vmem:[#allocation5 + $0x148] sm:$0xff] }
  0x6c   :  { %v549_v31 = vld [vmem:[#allocation5 + $0xf20] sm:$0xff]  ;;  %725 = vmatpush.msrb.mxu2 %v481_v30  ;;  %v170_v30 = vld [vmem:[#allocation5 + $0x348] sm:$0xff] }
  0x6d   :  { %v349_v33 = vld [vmem:[#allocation5 + $0x8e0] sm:$0xff]  ;;  %744 = vmatpush.msrb.mxu3 %v549_v31  ;;  %v234_v31 = vld [vmem:[#allocation5 + $0x548] sm:$0xff] }
  0x6e   :  { %v413_v34 = vld [vmem:[#allocation5 + $0xae0] sm:$0xff]  ;;  %686 = vmatpush.msrb.mxu0 %v349_v33  ;;  %v102_v33 = vld [vmem:[#allocation5 + $0x128] sm:$0xff] }
  0x6f   :  { %v477_v35 = vld [vmem:[#allocation5 + $0xce0] sm:$0xff]  ;;  %706 = vmatpush.msrb.mxu1 %v413_v34  ;;  %v166_v34 = vld [vmem:[#allocation5 + $0x328] sm:$0xff] }
  0x70   :  { %v545_v36 = vld [vmem:[#allocation5 + $0xf00] sm:$0xff]  ;;  %726 = vmatpush.msrb.mxu2 %v477_v35  ;;  %v230_v35 = vld [vmem:[#allocation5 + $0x528] sm:$0xff] }
  0x71   :  { %v345_v37 = vld [vmem:[#allocation5 + $0x8c0] sm:$0xff]  ;;  %745 = vmatpush.msrb.mxu3 %v545_v36  ;;  %v298_v36 = vld [vmem:[#allocation5 + $0x748] sm:$0xff] }
  0x72   :  { %v409_v38 = vld [vmem:[#allocation5 + $0xac0] sm:$0xff]  ;;  %687 = vmatpush.msrb.mxu0 %v345_v37  ;;  %v98_v37 = vld [vmem:[#allocation5 + $0x108] sm:$0xff] }
  0x73   :  { %v473_v39 = vld [vmem:[#allocation5 + $0xcc0] sm:$0xff]  ;;  %707 = vmatpush.msrb.mxu1 %v409_v38  ;;  %v162_v38 = vld [vmem:[#allocation5 + $0x308] sm:$0xff] }
  0x74   :  { %v541_v40 = vld [vmem:[#allocation5 + $0xee0] sm:$0xff]  ;;  %727 = vmatpush.msrb.mxu2 %v473_v39  ;;  %v226_v39 = vld [vmem:[#allocation5 + $0x508] sm:$0xff] }
  0x75   :  { %v341_v41 = vld [vmem:[#allocation5 + $0x8a0] sm:$0xff]  ;;  %746 = vmatpush.msrb.mxu3 %v541_v40  ;;  %v294_v40 = vld [vmem:[#allocation5 + $0x728] sm:$0xff] }
  0x76   :  { %v405_v42 = vld [vmem:[#allocation5 + $0xaa0] sm:$0xff]  ;;  %688 = vmatpush.msrb.mxu0 %v341_v41  ;;  %v94_v41 = vld [vmem:[#allocation5 + $0xe8] sm:$0xff] }
  0x77   :  { %v469_v43 = vld [vmem:[#allocation5 + $0xca0] sm:$0xff]  ;;  %708 = vmatpush.msrb.mxu1 %v405_v42  ;;  %v158_v42 = vld [vmem:[#allocation5 + $0x2e8] sm:$0xff] }
  0x78   :  { %v537_v44 = vld [vmem:[#allocation5 + $0xec0] sm:$0xff]  ;;  %728 = vmatpush.msrb.mxu2 %v469_v43  ;;  %v222_v43 = vld [vmem:[#allocation5 + $0x4e8] sm:$0xff] }
  0x79   :  { %v337_v45 = vld [vmem:[#allocation5 + $0x880] sm:$0xff]  ;;  %747 = vmatpush.msrb.mxu3 %v537_v44  ;;  %v290_v44 = vld [vmem:[#allocation5 + $0x708] sm:$0xff] }
  0x7a   :  { %v401_v46 = vld [vmem:[#allocation5 + $0xa80] sm:$0xff]  ;;  %689 = vmatpush.msrb.mxu0 %v337_v45  ;;  %v90_v45 = vld [vmem:[#allocation5 + $0xc8] sm:$0xff] }
  0x7b   :  { %v465_v47 = vld [vmem:[#allocation5 + $0xc80] sm:$0xff]  ;;  %709 = vmatpush.msrb.mxu1 %v401_v46  ;;  %v154_v46 = vld [vmem:[#allocation5 + $0x2c8] sm:$0xff] }
  0x7c   :  { %v533_v48 = vld [vmem:[#allocation5 + $0xea0] sm:$0xff]  ;;  %729 = vmatpush.msrb.mxu2 %v465_v47  ;;  %v218_v47 = vld [vmem:[#allocation5 + $0x4c8] sm:$0xff] }
  0x7d   :  { %v333_v49 = vld [vmem:[#allocation5 + $0x860] sm:$0xff]  ;;  %748 = vmatpush.msrb.mxu3 %v533_v48  ;;  %v286_v48 = vld [vmem:[#allocation5 + $0x6e8] sm:$0xff] }
  0x7e   :  { %v397_v50 = vld [vmem:[#allocation5 + $0xa60] sm:$0xff]  ;;  %690 = vmatpush.msrb.mxu0 %v333_v49  ;;  %v86_v49 = vld [vmem:[#allocation5 + $0xa8] sm:$0xff] }
  0x7f   :  { %v461_v51 = vld [vmem:[#allocation5 + $0xc60] sm:$0xff]  ;;  %710 = vmatpush.msrb.mxu1 %v397_v50  ;;  %v150_v50 = vld [vmem:[#allocation5 + $0x2a8] sm:$0xff] }
  0x80   :  { %v529_v52 = vld [vmem:[#allocation5 + $0xe80] sm:$0xff]  ;;  %730 = vmatpush.msrb.mxu2 %v461_v51  ;;  %v214_v51 = vld [vmem:[#allocation5 + $0x4a8] sm:$0xff] }
  0x81   :  { %v329_v53 = vld [vmem:[#allocation5 + $0x840] sm:$0xff]  ;;  %749 = vmatpush.msrb.mxu3 %v529_v52  ;;  %v282_v52 = vld [vmem:[#allocation5 + $0x6c8] sm:$0xff] }
  0x82   :  { %v393_v54 = vld [vmem:[#allocation5 + $0xa40] sm:$0xff]  ;;  %691 = vmatpush.msrb.mxu0 %v329_v53  ;;  %v82_v53 = vld [vmem:[#allocation5 + $0x88] sm:$0xff] }
  0x83   :  { %v457_v55 = vld [vmem:[#allocation5 + $0xc40] sm:$0xff]  ;;  %711 = vmatpush.msrb.mxu1 %v393_v54  ;;  %v146_v54 = vld [vmem:[#allocation5 + $0x288] sm:$0xff] }
  0x84   :  { %v525_v56 = vld [vmem:[#allocation5 + $0xe60] sm:$0xff]  ;;  %731 = vmatpush.msrb.mxu2 %v457_v55  ;;  %v210_v55 = vld [vmem:[#allocation5 + $0x488] sm:$0xff] }
  0x85   :  { %v325_v58 = vld [vmem:[#allocation5 + $0x820] sm:$0xff]  ;;  %750 = vmatpush.msrb.mxu3 %v525_v56  ;;  %v278_v56 = vld [vmem:[#allocation5 + $0x6a8] sm:$0xff] }
  0x86   :  { %v389_v59 = vld [vmem:[#allocation5 + $0xa20] sm:$0xff]  ;;  %692 = vmatpush.msrb.mxu0 %v325_v58  ;;  %v78_v58 = vld [vmem:[#allocation5 + $0x68] sm:$0xff] }
  0x87   :  { %v453_v60 = vld [vmem:[#allocation5 + $0xc20] sm:$0xff]  ;;  %712 = vmatpush.msrb.mxu1 %v389_v59  ;;  %v142_v59 = vld [vmem:[#allocation5 + $0x268] sm:$0xff] }
  0x88   :  { %v521_v61 = vld [vmem:[#allocation5 + $0xe40] sm:$0xff]  ;;  %732 = vmatpush.msrb.mxu2 %v453_v60  ;;  %v206_v60 = vld [vmem:[#allocation5 + $0x468] sm:$0xff] }
  0x89   :  { %v1810_v63 = vld.sshfl [vmem:[#allocation1 + $0x18] sm:$0xff pattern:$0x73625140]  ;;  %751 = vmatpush.msrb.mxu3 %v521_v61  ;;  %v274_v61 = vld [vmem:[#allocation5 + $0x688] sm:$0xff] }
  0x8a   :  { %v321_v0 = vld [vmem:[#allocation5 + $0x800] sm:$0xff]  ;;  %674 = vmatmul.f32.vlgmr.msra.gmra.mxu3 %v1810_v63 }
  0x8b   :  { %v385_v1 = vld [vmem:[#allocation5 + $0xa00] sm:$0xff]  ;;  %693 = vmatpush.msrb.mxu0 %v321_v0  ;;  %v74_v0 = vld [vmem:[#allocation5 + $0x48] sm:$0xff] }
  0x8c   :  { %v449_v2 = vld [vmem:[#allocation5 + $0xc00] sm:$0xff]  ;;  %713 = vmatpush.msrb.mxu1 %v385_v1  ;;  %694 = vmatmul.f32.vlgmr.msrb.gmra.mxu0 %v1819_v18  ;;  %v138_v1 = vld [vmem:[#allocation5 + $0x248] sm:$0xff] }
  0x8d   :  { %v517_v3 = vld [vmem:[#allocation5 + $0xe20] sm:$0xff]  ;;  %733 = vmatpush.msrb.mxu2 %v449_v2  ;;  %758 = vmatpush.msra.mxu0 %v126_v5  ;;  %v202_v2 = vld [vmem:[#allocation5 + $0x448] sm:$0xff] }
  0x8e   :  { %v513_v8 = vld [vmem:[#allocation5 + $0xe00] sm:$0xff]  ;;  %752 = vmatpush.msrb.mxu3 %v517_v3  ;;  %778 = vmatpush.msra.mxu1 %v190_v6  ;;  %v270_v3 = vld [vmem:[#allocation5 + $0x668] sm:$0xff] }
  0x8f   :  { %798 = vmatpush.msra.mxu2 %v254_v7  ;;  %759 = vmatpush.msra.mxu0 %v122_v9  ;;  %v1822_v19 = vld.sshfl [vmem:[#allocation1 + $0x38] sm:$0xff pattern:$0x73625140]  ;;  %v70_v5 = vld [vmem:[#allocation5 + $0x28] sm:$0xff] }
  0x90   :  { %753 = vmatpush.msrb.mxu3 %v513_v8  ;;  %779 = vmatpush.msra.mxu1 %v186_v10  ;;  %v134_v6 = vld [vmem:[#allocation5 + $0x228] sm:$0xff] }
  0x91   :  { %799 = vmatpush.msra.mxu2 %v250_v11  ;;  %760 = vmatpush.msra.mxu0 %v118_v14  ;;  %v198_v7 = vld [vmem:[#allocation5 + $0x428] sm:$0xff] }
  0x92   :  { %818 = vmatpush.msra.mxu3 %v318_v12  ;;  %734 = vmatmul.f32.vlgmr.msrb.gmra.mxu2 %v1817_v13  ;;  %v266_v8 = vld [vmem:[#allocation5 + $0x648] sm:$0xff] }
  0x93   :  { %780 = vmatpush.msra.mxu1 %v182_v15  ;;  %800 = vmatpush.msra.mxu2 %v246_v16  ;;  %v66_v9 = vld [vmem:[#allocation5 + $0x8] sm:$0xff] }
  0x94   :  { %819 = vmatpush.msra.mxu3 %v314_v17  ;;  %761 = vmatpush.msra.mxu0 %v114_v20  ;;  %v130_v10 = vld [vmem:[#allocation5 + $0x208] sm:$0xff] }
  0x95   :  { %754 = vmatmul.f32.vlgmr.msrb.gmra.mxu3 %v1822_v19  ;;  %781 = vmatpush.msra.mxu1 %v178_v21  ;;  %v194_v11 = vld [vmem:[#allocation5 + $0x408] sm:$0xff] }
  0x96   :  { %801 = vmatpush.msra.mxu2 %v242_v22  ;;  %820 = vmatpush.msra.mxu3 %v310_v23  ;;  %v262_v12 = vld [vmem:[#allocation5 + $0x628] sm:$0xff] }
  0x97   :  { %714 = vmatmul.f32.vlgmr.msrb.gmra.mxu1 %v1825_v24  ;;  %762 = vmatpush.msra.mxu0 %v110_v25  ;;  %v382_v14 = vld [vmem:[#allocation5 + $0x9e8] sm:$0xff] }
  0x98   :  { %782 = vmatpush.msra.mxu1 %v174_v26  ;;  %802 = vmatpush.msra.mxu2 %v238_v27  ;;  %v446_v15 = vld [vmem:[#allocation5 + $0xbe8] sm:$0xff] }
  0x99   :  { %821 = vmatpush.msra.mxu3 %v306_v28  ;;  %763 = vmatpush.msra.mxu0 %v106_v29  ;;  %v510_v16 = vld [vmem:[#allocation5 + $0xde8] sm:$0xff] }
  0x9a   :  { %783 = vmatpush.msra.mxu1 %v170_v30  ;;  %803 = vmatpush.msra.mxu2 %v234_v31  ;;  %v258_v17 = vld [vmem:[#allocation5 + $0x608] sm:$0xff] }
  0x9b   :  { %822 = vmatpush.msra.mxu3 %v302_v32  ;;  %764 = vmatpush.msra.mxu0 %v102_v33  ;;  %v378_v20 = vld [vmem:[#allocation5 + $0x9c8] sm:$0xff] }
  0x9c   :  { %784 = vmatpush.msra.mxu1 %v166_v34  ;;  %804 = vmatpush.msra.mxu2 %v230_v35  ;;  %v442_v21 = vld [vmem:[#allocation5 + $0xbc8] sm:$0xff] }
  0x9d   :  { %823 = vmatpush.msra.mxu3 %v298_v36  ;;  %765 = vmatpush.msra.mxu0 %v98_v37  ;;  %v506_v22 = vld [vmem:[#allocation5 + $0xdc8] sm:$0xff] }
  0x9e   :  { %785 = vmatpush.msra.mxu1 %v162_v38  ;;  %805 = vmatpush.msra.mxu2 %v226_v39  ;;  %v574_v23 = vld [vmem:[#allocation5 + $0xfe8] sm:$0xff] }
  0x9f   :  { %824 = vmatpush.msra.mxu3 %v294_v40  ;;  %766 = vmatpush.msra.mxu0 %v94_v41  ;;  %v374_v25 = vld [vmem:[#allocation5 + $0x9a8] sm:$0xff] }
  0xa0   :  { %786 = vmatpush.msra.mxu1 %v158_v42  ;;  %806 = vmatpush.msra.mxu2 %v222_v43  ;;  %v438_v26 = vld [vmem:[#allocation5 + $0xba8] sm:$0xff] }
  0xa1   :  { %825 = vmatpush.msra.mxu3 %v290_v44  ;;  %767 = vmatpush.msra.mxu0 %v90_v45  ;;  %v502_v27 = vld [vmem:[#allocation5 + $0xda8] sm:$0xff] }
  0xa2   :  { %787 = vmatpush.msra.mxu1 %v154_v46  ;;  %807 = vmatpush.msra.mxu2 %v218_v47  ;;  %v570_v28 = vld [vmem:[#allocation5 + $0xfc8] sm:$0xff] }
  0xa3   :  { %826 = vmatpush.msra.mxu3 %v286_v48  ;;  %768 = vmatpush.msra.mxu0 %v86_v49  ;;  %v370_v29 = vld [vmem:[#allocation5 + $0x988] sm:$0xff] }
  0xa4   :  { %788 = vmatpush.msra.mxu1 %v150_v50  ;;  %808 = vmatpush.msra.mxu2 %v214_v51  ;;  %v434_v30 = vld [vmem:[#allocation5 + $0xb88] sm:$0xff] }
  0xa5   :  { %827 = vmatpush.msra.mxu3 %v282_v52  ;;  %769 = vmatpush.msra.mxu0 %v82_v53  ;;  %v498_v31 = vld [vmem:[#allocation5 + $0xd88] sm:$0xff] }
  0xa6   :  { %789 = vmatpush.msra.mxu1 %v146_v54  ;;  %809 = vmatpush.msra.mxu2 %v210_v55  ;;  %v566_v32 = vld [vmem:[#allocation5 + $0xfa8] sm:$0xff] }
  0xa7   :  { %828 = vmatpush.msra.mxu3 %v278_v56  ;;  %770 = vmatpush.msra.mxu0 %v78_v58  ;;  %v366_v33 = vld [vmem:[#allocation5 + $0x968] sm:$0xff] }
  0xa8   :  { %790 = vmatpush.msra.mxu1 %v142_v59  ;;  %810 = vmatpush.msra.mxu2 %v206_v60  ;;  %v430_v34 = vld [vmem:[#allocation5 + $0xb68] sm:$0xff] }
  0xa9   :  { %829 = vmatpush.msra.mxu3 %v274_v61  ;;  %771 = vmatpush.msra.mxu0 %v74_v0  ;;  %v494_v35 = vld [vmem:[#allocation5 + $0xd68] sm:$0xff] }
  0xaa   :  { %791 = vmatpush.msra.mxu1 %v138_v1  ;;  %811 = vmatpush.msra.mxu2 %v202_v2  ;;  %v562_v36 = vld [vmem:[#allocation5 + $0xf88] sm:$0xff] }
  0xab   :  { %830 = vmatpush.msra.mxu3 %v270_v3  ;;  %772 = vmatpush.msra.mxu0 %v70_v5  ;;  %v362_v37 = vld [vmem:[#allocation5 + $0x948] sm:$0xff] }
  0xac   :  { %792 = vmatpush.msra.mxu1 %v134_v6  ;;  %812 = vmatpush.msra.mxu2 %v198_v7  ;;  %v426_v38 = vld [vmem:[#allocation5 + $0xb48] sm:$0xff] }
  0xad   :  { %831 = vmatpush.msra.mxu3 %v266_v8  ;;  %773 = vmatpush.msra.mxu0 %v66_v9  ;;  %v490_v39 = vld [vmem:[#allocation5 + $0xd48] sm:$0xff] }
  0xae   :  { %793 = vmatpush.msra.mxu1 %v130_v10  ;;  %813 = vmatpush.msra.mxu2 %v194_v11  ;;  %v558_v40 = vld [vmem:[#allocation5 + $0xf68] sm:$0xff] }
  0xaf   :  { %832 = vmatpush.msra.mxu3 %v262_v12  ;;  %838 = vmatpush.msrb.mxu0 %v382_v14  ;;  %v358_v41 = vld [vmem:[#allocation5 + $0x928] sm:$0xff] }
  0xb0   :  { %858 = vmatpush.msrb.mxu1 %v446_v15  ;;  %878 = vmatpush.msrb.mxu2 %v510_v16  ;;  %v422_v42 = vld [vmem:[#allocation5 + $0xb28] sm:$0xff] }
  0xb1   :  { %833 = vmatpush.msra.mxu3 %v258_v17  ;;  %839 = vmatpush.msrb.mxu0 %v378_v20  ;;  %v486_v43 = vld [vmem:[#allocation5 + $0xd28] sm:$0xff] }
  0xb2   :  { %859 = vmatpush.msrb.mxu1 %v442_v21  ;;  %879 = vmatpush.msrb.mxu2 %v506_v22  ;;  %v554_v44 = vld [vmem:[#allocation5 + $0xf48] sm:$0xff] }
  0xb3   :  { %898 = vmatpush.msrb.mxu3 %v574_v23  ;;  %840 = vmatpush.msrb.mxu0 %v374_v25  ;;  %v354_v45 = vld [vmem:[#allocation5 + $0x908] sm:$0xff]  ;;  %v127_v25 = vld [vmem:[#allocation5 + $0x1f0] sm:$0xff] }
  0xb4   :  { %860 = vmatpush.msrb.mxu1 %v438_v26  ;;  %880 = vmatpush.msrb.mxu2 %v502_v27  ;;  %v418_v46 = vld [vmem:[#allocation5 + $0xb08] sm:$0xff]  ;;  %v191_v26 = vld [vmem:[#allocation5 + $0x3f0] sm:$0xff] }
  0xb5   :  { %899 = vmatpush.msrb.mxu3 %v570_v28  ;;  %841 = vmatpush.msrb.mxu0 %v370_v29  ;;  %v482_v47 = vld [vmem:[#allocation5 + $0xd08] sm:$0xff]  ;;  %v255_v27 = vld [vmem:[#allocation5 + $0x5f0] sm:$0xff] }
  0xb6   :  { %861 = vmatpush.msrb.mxu1 %v434_v30  ;;  %881 = vmatpush.msrb.mxu2 %v498_v31  ;;  %v550_v48 = vld [vmem:[#allocation5 + $0xf28] sm:$0xff]  ;;  %v187_v29 = vld [vmem:[#allocation5 + $0x3d0] sm:$0xff] }
  0xb7   :  { %900 = vmatpush.msrb.mxu3 %v566_v32  ;;  %842 = vmatpush.msrb.mxu0 %v366_v33  ;;  %v350_v49 = vld [vmem:[#allocation5 + $0x8e8] sm:$0xff]  ;;  %v251_v30 = vld [vmem:[#allocation5 + $0x5d0] sm:$0xff] }
  0xb8   :  { %862 = vmatpush.msrb.mxu1 %v430_v34  ;;  %882 = vmatpush.msrb.mxu2 %v494_v35  ;;  %v414_v50 = vld [vmem:[#allocation5 + $0xae8] sm:$0xff]  ;;  %v319_v31 = vld [vmem:[#allocation5 + $0x7f0] sm:$0xff] }
  0xb9   :  { %901 = vmatpush.msrb.mxu3 %v562_v36  ;;  %843 = vmatpush.msrb.mxu0 %v362_v37  ;;  %v478_v51 = vld [vmem:[#allocation5 + $0xce8] sm:$0xff]  ;;  %v247_v32 = vld [vmem:[#allocation5 + $0x5b0] sm:$0xff] }
  0xba   :  { %863 = vmatpush.msrb.mxu1 %v426_v38  ;;  %883 = vmatpush.msrb.mxu2 %v490_v39  ;;  %v546_v52 = vld [vmem:[#allocation5 + $0xf08] sm:$0xff]  ;;  %v315_v33 = vld [vmem:[#allocation5 + $0x7d0] sm:$0xff] }
  0xbb   :  { %902 = vmatpush.msrb.mxu3 %v558_v40  ;;  %844 = vmatpush.msrb.mxu0 %v358_v41  ;;  %v346_v53 = vld [vmem:[#allocation5 + $0x8c8] sm:$0xff]  ;;  %v179_v34 = vld [vmem:[#allocation5 + $0x390] sm:$0xff] }
  0xbc   :  { %864 = vmatpush.msrb.mxu1 %v422_v42  ;;  %884 = vmatpush.msrb.mxu2 %v486_v43  ;;  %v410_v54 = vld [vmem:[#allocation5 + $0xac8] sm:$0xff]  ;;  %v243_v35 = vld [vmem:[#allocation5 + $0x590] sm:$0xff] }
  0xbd   :  { %903 = vmatpush.msrb.mxu3 %v554_v44  ;;  %845 = vmatpush.msrb.mxu0 %v354_v45  ;;  %v474_v55 = vld [vmem:[#allocation5 + $0xcc8] sm:$0xff]  ;;  %v311_v36 = vld [vmem:[#allocation5 + $0x7b0] sm:$0xff] }
  0xbe   :  { %865 = vmatpush.msrb.mxu1 %v418_v46  ;;  %885 = vmatpush.msrb.mxu2 %v482_v47  ;;  %v542_v56 = vld [vmem:[#allocation5 + $0xee8] sm:$0xff]  ;;  %v111_v37 = vld [vmem:[#allocation5 + $0x170] sm:$0xff] }
  0xbf   :  { %904 = vmatpush.msrb.mxu3 %v550_v48  ;;  %846 = vmatpush.msrb.mxu0 %v350_v49  ;;  %v342_v58 = vld [vmem:[#allocation5 + $0x8a8] sm:$0xff]  ;;  %v175_v38 = vld [vmem:[#allocation5 + $0x370] sm:$0xff] }
  0xc0   :  { %866 = vmatpush.msrb.mxu1 %v414_v50  ;;  %886 = vmatpush.msrb.mxu2 %v478_v51  ;;  %v406_v59 = vld [vmem:[#allocation5 + $0xaa8] sm:$0xff]  ;;  %v239_v39 = vld [vmem:[#allocation5 + $0x570] sm:$0xff] }
  0xc1   :  { %905 = vmatpush.msrb.mxu3 %v546_v52  ;;  %847 = vmatpush.msrb.mxu0 %v346_v53  ;;  %v470_v60 = vld [vmem:[#allocation5 + $0xca8] sm:$0xff]  ;;  %v307_v40 = vld [vmem:[#allocation5 + $0x790] sm:$0xff] }
  0xc2   :  { %867 = vmatpush.msrb.mxu1 %v410_v54  ;;  %v538_v61 = vld [vmem:[#allocation5 + $0xec8] sm:$0xff]  ;;  %887 = vmatpush.msrb.mxu2 %v474_v55  ;;  %v171_v41 = vld [vmem:[#allocation5 + $0x350] sm:$0xff] }
  0xc3   :  { %906 = vmatpush.msrb.mxu3 %v542_v56  ;;  %v338_v0 = vld [vmem:[#allocation5 + $0x888] sm:$0xff]  ;;  %848 = vmatpush.msrb.mxu0 %v342_v58  ;;  %v235_v42 = vld [vmem:[#allocation5 + $0x550] sm:$0xff] }
  0xc4   :  { %v402_v1 = vld [vmem:[#allocation5 + $0xa88] sm:$0xff]  ;;  %868 = vmatpush.msrb.mxu1 %v406_v59  ;;  %888 = vmatpush.msrb.mxu2 %v470_v60  ;;  %v303_v43 = vld [vmem:[#allocation5 + $0x770] sm:$0xff] }
  0xc5   :  { %v466_v2 = vld [vmem:[#allocation5 + $0xc88] sm:$0xff]  ;;  %907 = vmatpush.msrb.mxu3 %v538_v61  ;;  %849 = vmatpush.msrb.mxu0 %v338_v0  ;;  %v231_v44 = vld [vmem:[#allocation5 + $0x530] sm:$0xff] }
  0xc6   :  { %v534_v3 = vld [vmem:[#allocation5 + $0xea8] sm:$0xff]  ;;  %869 = vmatpush.msrb.mxu1 %v402_v1  ;;  %889 = vmatpush.msrb.mxu2 %v466_v2  ;;  %v299_v45 = vld [vmem:[#allocation5 + $0x750] sm:$0xff] }
  0xc7   :  { %v334_v5 = vld [vmem:[#allocation5 + $0x868] sm:$0xff]  ;;  %908 = vmatpush.msrb.mxu3 %v534_v3  ;;  %814 = vmatmul.f32.vlgmr.msra.gmra.mxu2 %v1805_v57  ;;  %v123_v57 = vld [vmem:[#allocation5 + $0x1d0] sm:$0xff] }
  0xc8   :  { %v398_v6 = vld [vmem:[#allocation5 + $0xa68] sm:$0xff]  ;;  %850 = vmatpush.msrb.mxu0 %v334_v5  ;;  %834 = vmatmul.f32.vlgmr.msra.gmra.mxu3 %v1810_v63  ;;  %v183_v63 = vld [vmem:[#allocation5 + $0x3b0] sm:$0xff] }
  0xc9   :  { %v462_v7 = vld [vmem:[#allocation5 + $0xc68] sm:$0xff]  ;;  %870 = vmatpush.msrb.mxu1 %v398_v6  ;;  %774 = vmatmul.f32.vlgmr.msra.gmra.mxu0 %v1807_v62  ;;  %v119_v62 = vld [vmem:[#allocation5 + $0x1b0] sm:$0xff] }
  0xca   :  { %v530_v8 = vld [vmem:[#allocation5 + $0xe88] sm:$0xff]  ;;  %890 = vmatpush.msrb.mxu2 %v462_v7  ;;  %794 = vmatmul.f32.vlgmr.msra.gmra.mxu1 %v1813_v4  ;;  %v115_v4 = vld [vmem:[#allocation5 + $0x190] sm:$0xff] }
  0xcb   :  { %v330_v9 = vld [vmem:[#allocation5 + $0x848] sm:$0xff]  ;;  %909 = vmatpush.msrb.mxu3 %v530_v8  ;;  %v99_v46 = vld [vmem:[#allocation5 + $0x110] sm:$0xff] }
  0xcc   :  { %v394_v10 = vld [vmem:[#allocation5 + $0xa48] sm:$0xff]  ;;  %851 = vmatpush.msrb.mxu0 %v330_v9  ;;  %v163_v47 = vld [vmem:[#allocation5 + $0x310] sm:$0xff] }
  0xcd   :  { %v458_v11 = vld [vmem:[#allocation5 + $0xc48] sm:$0xff]  ;;  %871 = vmatpush.msrb.mxu1 %v394_v10  ;;  %v295_v48 = vld [vmem:[#allocation5 + $0x730] sm:$0xff] }
  0xce   :  { %v526_v12 = vld [vmem:[#allocation5 + $0xe68] sm:$0xff]  ;;  %891 = vmatpush.msrb.mxu2 %v458_v11  ;;  %v95_v49 = vld [vmem:[#allocation5 + $0xf0] sm:$0xff] }
  0xcf   :  { %v326_v14 = vld [vmem:[#allocation5 + $0x828] sm:$0xff]  ;;  %910 = vmatpush.msrb.mxu3 %v526_v12  ;;  %v159_v50 = vld [vmem:[#allocation5 + $0x2f0] sm:$0xff] }
  0xd0   :  { %v390_v15 = vld [vmem:[#allocation5 + $0xa28] sm:$0xff]  ;;  %852 = vmatpush.msrb.mxu0 %v326_v14  ;;  %v223_v51 = vld [vmem:[#allocation5 + $0x4f0] sm:$0xff] }
  0xd1   :  { %v454_v16 = vld [vmem:[#allocation5 + $0xc28] sm:$0xff]  ;;  %872 = vmatpush.msrb.mxu1 %v390_v15  ;;  %v291_v52 = vld [vmem:[#allocation5 + $0x710] sm:$0xff] }
  0xd2   :  { %v522_v17 = vld [vmem:[#allocation5 + $0xe48] sm:$0xff]  ;;  %892 = vmatpush.msrb.mxu2 %v454_v16  ;;  %v91_v53 = vld [vmem:[#allocation5 + $0xd0] sm:$0xff] }
  0xd3   :  { %v322_v20 = vld [vmem:[#allocation5 + $0x808] sm:$0xff]  ;;  %911 = vmatpush.msrb.mxu3 %v522_v17  ;;  %v155_v54 = vld [vmem:[#allocation5 + $0x2d0] sm:$0xff] }
  0xd4   :  { %v386_v21 = vld [vmem:[#allocation5 + $0xa08] sm:$0xff]  ;;  %853 = vmatpush.msrb.mxu0 %v322_v20  ;;  %v219_v55 = vld [vmem:[#allocation5 + $0x4d0] sm:$0xff] }
  0xd5   :  { %v450_v22 = vld [vmem:[#allocation5 + $0xc08] sm:$0xff]  ;;  %873 = vmatpush.msrb.mxu1 %v386_v21  ;;  %854 = vmatmul.f32.vlgmr.msrb.gmra.mxu0 %v1819_v18  ;;  %v103_v18 = vld [vmem:[#allocation5 + $0x130] sm:$0xff] }
  0xd6   :  { %v518_v23 = vld [vmem:[#allocation5 + $0xe28] sm:$0xff]  ;;  %893 = vmatpush.msrb.mxu2 %v450_v22  ;;  %918 = vmatpush.msra.mxu0 %v127_v25  ;;  %v287_v56 = vld [vmem:[#allocation5 + $0x6f0] sm:$0xff] }
  0xd7   :  { %v514_v28 = vld [vmem:[#allocation5 + $0xe08] sm:$0xff]  ;;  %912 = vmatpush.msrb.mxu3 %v518_v23  ;;  %938 = vmatpush.msra.mxu1 %v191_v26  ;;  %v87_v58 = vld [vmem:[#allocation5 + $0xb0] sm:$0xff] }
  0xd8   :  { %958 = vmatpush.msra.mxu2 %v255_v27  ;;  %919 = vmatpush.msra.mxu0 %v123_v57  ;;  %v151_v59 = vld [vmem:[#allocation5 + $0x2b0] sm:$0xff] }
  0xd9   :  { %913 = vmatpush.msrb.mxu3 %v514_v28  ;;  %939 = vmatpush.msra.mxu1 %v187_v29  ;;  %v215_v60 = vld [vmem:[#allocation5 + $0x4b0] sm:$0xff] }
  0xda   :  { %959 = vmatpush.msra.mxu2 %v251_v30  ;;  %920 = vmatpush.msra.mxu0 %v119_v62  ;;  %v283_v61 = vld [vmem:[#allocation5 + $0x6d0] sm:$0xff] }
  0xdb   :  { %978 = vmatpush.msra.mxu3 %v319_v31  ;;  %894 = vmatmul.f32.vlgmr.msrb.gmra.mxu2 %v1817_v13  ;;  %v107_v13 = vld [vmem:[#allocation5 + $0x150] sm:$0xff] }
  0xdc   :  { %940 = vmatpush.msra.mxu1 %v183_v63  ;;  %960 = vmatpush.msra.mxu2 %v247_v32  ;;  %v83_v0 = vld [vmem:[#allocation5 + $0x90] sm:$0xff] }
  0xdd   :  { %979 = vmatpush.msra.mxu3 %v315_v33  ;;  %921 = vmatpush.msra.mxu0 %v115_v4  ;;  %v147_v1 = vld [vmem:[#allocation5 + $0x290] sm:$0xff] }
  0xde   :  { %914 = vmatmul.f32.vlgmr.msrb.gmra.mxu3 %v1822_v19  ;;  %941 = vmatpush.msra.mxu1 %v179_v34  ;;  %v167_v19 = vld [vmem:[#allocation5 + $0x330] sm:$0xff] }
  0xdf   :  { %961 = vmatpush.msra.mxu2 %v243_v35  ;;  %980 = vmatpush.msra.mxu3 %v311_v36  ;;  %v211_v2 = vld [vmem:[#allocation5 + $0x490] sm:$0xff] }
  0xe0   :  { %874 = vmatmul.f32.vlgmr.msrb.gmra.mxu1 %v1825_v24  ;;  %922 = vmatpush.msra.mxu0 %v111_v37  ;;  %v227_v24 = vld [vmem:[#allocation5 + $0x510] sm:$0xff] }
  0xe1   :  { %942 = vmatpush.msra.mxu1 %v175_v38  ;;  %962 = vmatpush.msra.mxu2 %v239_v39  ;;  %v279_v3 = vld [vmem:[#allocation5 + $0x6b0] sm:$0xff] }
  0xe2   :  { %981 = vmatpush.msra.mxu3 %v307_v40  ;;  %923 = vmatpush.msra.mxu0 %v107_v13  ;;  %v79_v5 = vld [vmem:[#allocation5 + $0x70] sm:$0xff] }
  0xe3   :  { %943 = vmatpush.msra.mxu1 %v171_v41  ;;  %963 = vmatpush.msra.mxu2 %v235_v42  ;;  %v143_v6 = vld [vmem:[#allocation5 + $0x270] sm:$0xff] }
  0xe4   :  { %982 = vmatpush.msra.mxu3 %v303_v43  ;;  %924 = vmatpush.msra.mxu0 %v103_v18  ;;  %v207_v7 = vld [vmem:[#allocation5 + $0x470] sm:$0xff] }
  0xe5   :  { %944 = vmatpush.msra.mxu1 %v167_v19  ;;  %964 = vmatpush.msra.mxu2 %v231_v44  ;;  %v275_v8 = vld [vmem:[#allocation5 + $0x690] sm:$0xff] }
  0xe6   :  { %983 = vmatpush.msra.mxu3 %v299_v45  ;;  %925 = vmatpush.msra.mxu0 %v99_v46  ;;  %v75_v9 = vld [vmem:[#allocation5 + $0x50] sm:$0xff] }
  0xe7   :  { %945 = vmatpush.msra.mxu1 %v163_v47  ;;  %965 = vmatpush.msra.mxu2 %v227_v24  ;;  %v139_v10 = vld [vmem:[#allocation5 + $0x250] sm:$0xff] }
  0xe8   :  { %984 = vmatpush.msra.mxu3 %v295_v48  ;;  %926 = vmatpush.msra.mxu0 %v95_v49  ;;  %v203_v11 = vld [vmem:[#allocation5 + $0x450] sm:$0xff] }
  0xe9   :  { %946 = vmatpush.msra.mxu1 %v159_v50  ;;  %966 = vmatpush.msra.mxu2 %v223_v51  ;;  %v271_v12 = vld [vmem:[#allocation5 + $0x670] sm:$0xff] }
  0xea   :  { %985 = vmatpush.msra.mxu3 %v291_v52  ;;  %927 = vmatpush.msra.mxu0 %v91_v53  ;;  %v71_v14 = vld [vmem:[#allocation5 + $0x30] sm:$0xff] }
  0xeb   :  { %947 = vmatpush.msra.mxu1 %v155_v54  ;;  %967 = vmatpush.msra.mxu2 %v219_v55  ;;  %v135_v15 = vld [vmem:[#allocation5 + $0x230] sm:$0xff] }
  0xec   :  { %986 = vmatpush.msra.mxu3 %v287_v56  ;;  %928 = vmatpush.msra.mxu0 %v87_v58  ;;  %v199_v16 = vld [vmem:[#allocation5 + $0x430] sm:$0xff] }
  0xed   :  { %948 = vmatpush.msra.mxu1 %v151_v59  ;;  %968 = vmatpush.msra.mxu2 %v215_v60  ;;  %v267_v17 = vld [vmem:[#allocation5 + $0x650] sm:$0xff] }
  0xee   :  { %987 = vmatpush.msra.mxu3 %v283_v61  ;;  %929 = vmatpush.msra.mxu0 %v83_v0  ;;  %v67_v20 = vld [vmem:[#allocation5 + $0x10] sm:$0xff] }
  0xef   :  { %949 = vmatpush.msra.mxu1 %v147_v1  ;;  %969 = vmatpush.msra.mxu2 %v211_v2  ;;  %v131_v21 = vld [vmem:[#allocation5 + $0x210] sm:$0xff] }
  0xf0   :  { %988 = vmatpush.msra.mxu3 %v279_v3  ;;  %930 = vmatpush.msra.mxu0 %v79_v5  ;;  %v195_v22 = vld [vmem:[#allocation5 + $0x410] sm:$0xff] }
  0xf1   :  { %950 = vmatpush.msra.mxu1 %v143_v6  ;;  %970 = vmatpush.msra.mxu2 %v207_v7  ;;  %v263_v23 = vld [vmem:[#allocation5 + $0x630] sm:$0xff] }
  0xf2   :  { %989 = vmatpush.msra.mxu3 %v275_v8  ;;  %931 = vmatpush.msra.mxu0 %v75_v9  ;;  %v383_v25 = vld [vmem:[#allocation5 + $0x9f0] sm:$0xff]  ;;  %v1837_v9 = vld.sshfl [vmem:[#allocation1 + $0x10] sm:$0xff pattern:$0x73625140] }
  0xf3   :  { %951 = vmatpush.msra.mxu1 %v139_v10  ;;  %971 = vmatpush.msra.mxu2 %v203_v11  ;;  %v447_v26 = vld [vmem:[#allocation5 + $0xbf0] sm:$0xff] }
  0xf4   :  { %990 = vmatpush.msra.mxu3 %v271_v12  ;;  %932 = vmatpush.msra.mxu0 %v71_v14  ;;  %v511_v27 = vld [vmem:[#allocation5 + $0xdf0] sm:$0xff]  ;;  %v1840_v14 = vld.sshfl [vmem:[#allocation1] sm:$0xff pattern:$0x73625140] }
  0xf5   :  { %952 = vmatpush.msra.mxu1 %v135_v15  ;;  %972 = vmatpush.msra.mxu2 %v199_v16  ;;  %v259_v28 = vld [vmem:[#allocation5 + $0x610] sm:$0xff]  ;;  %v1843_v16 = vld.sshfl [vmem:[#allocation1 + $0x18] sm:$0xff pattern:$0x73625140] }
  0xf6   :  { %991 = vmatpush.msra.mxu3 %v267_v17  ;;  %933 = vmatpush.msra.mxu0 %v67_v20  ;;  %v379_v57 = vld [vmem:[#allocation5 + $0x9d0] sm:$0xff] }
  0xf7   :  { %953 = vmatpush.msra.mxu1 %v131_v21  ;;  %973 = vmatpush.msra.mxu2 %v195_v22  ;;  %v443_v29 = vld [vmem:[#allocation5 + $0xbd0] sm:$0xff] }
  0xf8   :  { %992 = vmatpush.msra.mxu3 %v263_v23  ;;  %998 = vmatpush.msrb.mxu0 %v383_v25  ;;  %v507_v30 = vld [vmem:[#allocation5 + $0xdd0] sm:$0xff] }
  0xf9   :  { %1018 = vmatpush.msrb.mxu1 %v447_v26  ;;  %v575_v31 = vld [vmem:[#allocation5 + $0xff0] sm:$0xff]  ;;  %1038 = vmatpush.msrb.mxu2 %v511_v27 }
  0xfa   :  { %993 = vmatpush.msra.mxu3 %v259_v28  ;;  %v375_v62 = vld [vmem:[#allocation5 + $0x9b0] sm:$0xff]  ;;  %999 = vmatpush.msrb.mxu0 %v379_v57  ;;  %v128_v57 = vld [vmem:[#allocation5 + $0x1f8] sm:$0xff] }
  0xfb   :  { %v439_v63 = vld [vmem:[#allocation5 + $0xbb0] sm:$0xff]  ;;  %1019 = vmatpush.msrb.mxu1 %v443_v29  ;;  %1039 = vmatpush.msrb.mxu2 %v507_v30  ;;  %v192_v29 = vld [vmem:[#allocation5 + $0x3f8] sm:$0xff] }
  0xfc   :  { %v503_v32 = vld [vmem:[#allocation5 + $0xdb0] sm:$0xff]  ;;  %1058 = vmatpush.msrb.mxu3 %v575_v31  ;;  %1000 = vmatpush.msrb.mxu0 %v375_v62  ;;  %v256_v30 = vld [vmem:[#allocation5 + $0x5f8] sm:$0xff] }
  0xfd   :  { %v571_v33 = vld [vmem:[#allocation5 + $0xfd0] sm:$0xff]  ;;  %1020 = vmatpush.msrb.mxu1 %v439_v63  ;;  %1040 = vmatpush.msrb.mxu2 %v503_v32  ;;  %v1849_v62 = vld.sshfl [vmem:[#allocation1 + $0x30] sm:$0xff pattern:$0x73625140] }
  0xfe   :  { %v371_v4 = vld [vmem:[#allocation5 + $0x990] sm:$0xff]  ;;  %1059 = vmatpush.msrb.mxu3 %v571_v33  ;;  %974 = vmatmul.f32.vlgmr.msra.gmra.mxu2 %v1837_v9  ;;  %v124_v63 = vld [vmem:[#allocation5 + $0x1d8] sm:$0xff] }
  0xff   :  { %v435_v34 = vld [vmem:[#allocation5 + $0xb90] sm:$0xff]  ;;  %1001 = vmatpush.msrb.mxu0 %v371_v4  ;;  %994 = vmatmul.f32.vlgmr.msra.gmra.mxu3 %v1843_v16  ;;  %v188_v32 = vld [vmem:[#allocation5 + $0x3d8] sm:$0xff]  ;;  %v1852_v4 = vld.sshfl [vmem:[#allocation1 + $0x20] sm:$0xff pattern:$0x73625140] }
 0x100   :  { %v499_v35 = vld [vmem:[#allocation5 + $0xd90] sm:$0xff]  ;;  %1021 = vmatpush.msrb.mxu1 %v435_v34  ;;  %934 = vmatmul.f32.vlgmr.msra.gmra.mxu0 %v1840_v14  ;;  %v252_v33 = vld [vmem:[#allocation5 + $0x5d8] sm:$0xff] }
 0x101   :  { %v567_v36 = vld [vmem:[#allocation5 + $0xfb0] sm:$0xff]  ;;  %1041 = vmatpush.msrb.mxu2 %v499_v35  ;;  %v320_v34 = vld [vmem:[#allocation5 + $0x7f8] sm:$0xff]  ;;  %v1855_v35 = vld.sshfl [vmem:[#allocation1 + $0x38] sm:$0xff pattern:$0x73625140] }
 0x102   :  { %v367_v37 = vld [vmem:[#allocation5 + $0x970] sm:$0xff]  ;;  %1060 = vmatpush.msrb.mxu3 %v567_v36  ;;  %v120_v36 = vld [vmem:[#allocation5 + $0x1b8] sm:$0xff] }
 0x103   :  { %v431_v38 = vld [vmem:[#allocation5 + $0xb70] sm:$0xff]  ;;  %1002 = vmatpush.msrb.mxu0 %v367_v37  ;;  %v184_v37 = vld [vmem:[#allocation5 + $0x3b8] sm:$0xff] }
 0x104   :  { %v495_v39 = vld [vmem:[#allocation5 + $0xd70] sm:$0xff]  ;;  %1022 = vmatpush.msrb.mxu1 %v431_v38  ;;  %v248_v38 = vld [vmem:[#allocation5 + $0x5b8] sm:$0xff] }
 0x105   :  { %v563_v40 = vld [vmem:[#allocation5 + $0xf90] sm:$0xff]  ;;  %1042 = vmatpush.msrb.mxu2 %v495_v39  ;;  %v316_v39 = vld [vmem:[#allocation5 + $0x7d8] sm:$0xff] }
 0x106   :  { %v363_v13 = vld [vmem:[#allocation5 + $0x950] sm:$0xff]  ;;  %1061 = vmatpush.msrb.mxu3 %v563_v40 }
 0x107   :  { %v427_v41 = vld [vmem:[#allocation5 + $0xb50] sm:$0xff]  ;;  %1003 = vmatpush.msrb.mxu0 %v363_v13  ;;  %v116_v13 = vld [vmem:[#allocation5 + $0x198] sm:$0xff] }
 0x108   :  { %v491_v42 = vld [vmem:[#allocation5 + $0xd50] sm:$0xff]  ;;  %1023 = vmatpush.msrb.mxu1 %v427_v41  ;;  %v180_v41 = vld [vmem:[#allocation5 + $0x398] sm:$0xff] }
 0x109   :  { %v559_v43 = vld [vmem:[#allocation5 + $0xf70] sm:$0xff]  ;;  %1043 = vmatpush.msrb.mxu2 %v491_v42  ;;  %v244_v42 = vld [vmem:[#allocation5 + $0x598] sm:$0xff] }
 0x10a   :  { %v359_v18 = vld [vmem:[#allocation5 + $0x930] sm:$0xff]  ;;  %1062 = vmatpush.msrb.mxu3 %v559_v43  ;;  %v312_v43 = vld [vmem:[#allocation5 + $0x7b8] sm:$0xff] }
 0x10b   :  { %v423_v19 = vld [vmem:[#allocation5 + $0xb30] sm:$0xff]  ;;  %1004 = vmatpush.msrb.mxu0 %v359_v18  ;;  %v112_v18 = vld [vmem:[#allocation5 + $0x178] sm:$0xff] }
 0x10c   :  { %v487_v44 = vld [vmem:[#allocation5 + $0xd30] sm:$0xff]  ;;  %1024 = vmatpush.msrb.mxu1 %v423_v19  ;;  %v176_v19 = vld [vmem:[#allocation5 + $0x378] sm:$0xff] }
 0x10d   :  { %v555_v45 = vld [vmem:[#allocation5 + $0xf50] sm:$0xff]  ;;  %1044 = vmatpush.msrb.mxu2 %v487_v44  ;;  %v240_v44 = vld [vmem:[#allocation5 + $0x578] sm:$0xff] }
 0x10e   :  { %v355_v46 = vld [vmem:[#allocation5 + $0x910] sm:$0xff]  ;;  %1063 = vmatpush.msrb.mxu3 %v555_v45  ;;  %v308_v45 = vld [vmem:[#allocation5 + $0x798] sm:$0xff] }
 0x10f   :  { %v419_v47 = vld [vmem:[#allocation5 + $0xb10] sm:$0xff]  ;;  %1005 = vmatpush.msrb.mxu0 %v355_v46  ;;  %v108_v46 = vld [vmem:[#allocation5 + $0x158] sm:$0xff] }
 0x110   :  { %v483_v24 = vld [vmem:[#allocation5 + $0xd10] sm:$0xff]  ;;  %1025 = vmatpush.msrb.mxu1 %v419_v47  ;;  %v172_v47 = vld [vmem:[#allocation5 + $0x358] sm:$0xff] }
 0x111   :  { %v551_v48 = vld [vmem:[#allocation5 + $0xf30] sm:$0xff]  ;;  %1045 = vmatpush.msrb.mxu2 %v483_v24  ;;  %v236_v24 = vld [vmem:[#allocation5 + $0x558] sm:$0xff] }
 0x112   :  { %v351_v49 = vld [vmem:[#allocation5 + $0x8f0] sm:$0xff]  ;;  %1064 = vmatpush.msrb.mxu3 %v551_v48  ;;  %v304_v48 = vld [vmem:[#allocation5 + $0x778] sm:$0xff] }
 0x113   :  { %v415_v50 = vld [vmem:[#allocation5 + $0xaf0] sm:$0xff]  ;;  %1006 = vmatpush.msrb.mxu0 %v351_v49  ;;  %v104_v49 = vld [vmem:[#allocation5 + $0x138] sm:$0xff] }
 0x114   :  { %v479_v51 = vld [vmem:[#allocation5 + $0xcf0] sm:$0xff]  ;;  %1026 = vmatpush.msrb.mxu1 %v415_v50  ;;  %v168_v50 = vld [vmem:[#allocation5 + $0x338] sm:$0xff] }
 0x115   :  { %v547_v52 = vld [vmem:[#allocation5 + $0xf10] sm:$0xff]  ;;  %1046 = vmatpush.msrb.mxu2 %v479_v51  ;;  %v232_v51 = vld [vmem:[#allocation5 + $0x538] sm:$0xff] }
 0x116   :  { %v347_v53 = vld [vmem:[#allocation5 + $0x8d0] sm:$0xff]  ;;  %1065 = vmatpush.msrb.mxu3 %v547_v52  ;;  %v300_v52 = vld [vmem:[#allocation5 + $0x758] sm:$0xff] }
 0x117   :  { %v411_v54 = vld [vmem:[#allocation5 + $0xad0] sm:$0xff]  ;;  %1007 = vmatpush.msrb.mxu0 %v347_v53  ;;  %v100_v53 = vld [vmem:[#allocation5 + $0x118] sm:$0xff] }
 0x118   :  { %v475_v55 = vld [vmem:[#allocation5 + $0xcd0] sm:$0xff]  ;;  %1027 = vmatpush.msrb.mxu1 %v411_v54  ;;  %v164_v54 = vld [vmem:[#allocation5 + $0x318] sm:$0xff] }
 0x119   :  { %v543_v56 = vld [vmem:[#allocation5 + $0xef0] sm:$0xff]  ;;  %1047 = vmatpush.msrb.mxu2 %v475_v55  ;;  %v228_v55 = vld [vmem:[#allocation5 + $0x518] sm:$0xff] }
 0x11a   :  { %v343_v58 = vld [vmem:[#allocation5 + $0x8b0] sm:$0xff]  ;;  %1066 = vmatpush.msrb.mxu3 %v543_v56  ;;  %v296_v56 = vld [vmem:[#allocation5 + $0x738] sm:$0xff] }
 0x11b   :  { %v407_v59 = vld [vmem:[#allocation5 + $0xab0] sm:$0xff]  ;;  %1008 = vmatpush.msrb.mxu0 %v343_v58  ;;  %v96_v58 = vld [vmem:[#allocation5 + $0xf8] sm:$0xff] }
 0x11c   :  { %v471_v60 = vld [vmem:[#allocation5 + $0xcb0] sm:$0xff]  ;;  %1028 = vmatpush.msrb.mxu1 %v407_v59  ;;  %v160_v59 = vld [vmem:[#allocation5 + $0x2f8] sm:$0xff] }
 0x11d   :  { %v539_v61 = vld [vmem:[#allocation5 + $0xed0] sm:$0xff]  ;;  %1048 = vmatpush.msrb.mxu2 %v471_v60  ;;  %v224_v60 = vld [vmem:[#allocation5 + $0x4f8] sm:$0xff] }
 0x11e   :  { %v339_v0 = vld [vmem:[#allocation5 + $0x890] sm:$0xff]  ;;  %1067 = vmatpush.msrb.mxu3 %v539_v61  ;;  %v292_v61 = vld [vmem:[#allocation5 + $0x718] sm:$0xff] }
 0x11f   :  { %v403_v1 = vld [vmem:[#allocation5 + $0xa90] sm:$0xff]  ;;  %1009 = vmatpush.msrb.mxu0 %v339_v0  ;;  %v92_v0 = vld [vmem:[#allocation5 + $0xd8] sm:$0xff] }
 0x120   :  { %v467_v2 = vld [vmem:[#allocation5 + $0xc90] sm:$0xff]  ;;  %1029 = vmatpush.msrb.mxu1 %v403_v1  ;;  %v156_v1 = vld [vmem:[#allocation5 + $0x2d8] sm:$0xff] }
 0x121   :  { %v535_v3 = vld [vmem:[#allocation5 + $0xeb0] sm:$0xff]  ;;  %1049 = vmatpush.msrb.mxu2 %v467_v2  ;;  %v220_v2 = vld [vmem:[#allocation5 + $0x4d8] sm:$0xff] }
 0x122   :  { %v335_v5 = vld [vmem:[#allocation5 + $0x870] sm:$0xff]  ;;  %1068 = vmatpush.msrb.mxu3 %v535_v3  ;;  %v288_v3 = vld [vmem:[#allocation5 + $0x6f8] sm:$0xff] }
 0x123   :  { %v399_v6 = vld [vmem:[#allocation5 + $0xa70] sm:$0xff]  ;;  %1010 = vmatpush.msrb.mxu0 %v335_v5  ;;  %v88_v5 = vld [vmem:[#allocation5 + $0xb8] sm:$0xff] }
 0x124   :  { %v463_v7 = vld [vmem:[#allocation5 + $0xc70] sm:$0xff]  ;;  %1030 = vmatpush.msrb.mxu1 %v399_v6  ;;  %v152_v6 = vld [vmem:[#allocation5 + $0x2b8] sm:$0xff] }
 0x125   :  { %v531_v8 = vld [vmem:[#allocation5 + $0xe90] sm:$0xff]  ;;  %1050 = vmatpush.msrb.mxu2 %v463_v7  ;;  %v216_v7 = vld [vmem:[#allocation5 + $0x4b8] sm:$0xff] }
 0x126   :  { %v331_v10 = vld [vmem:[#allocation5 + $0x850] sm:$0xff]  ;;  %1069 = vmatpush.msrb.mxu3 %v531_v8  ;;  %v284_v8 = vld [vmem:[#allocation5 + $0x6d8] sm:$0xff] }
 0x127   :  { %v395_v11 = vld [vmem:[#allocation5 + $0xa50] sm:$0xff]  ;;  %1011 = vmatpush.msrb.mxu0 %v331_v10  ;;  %v84_v10 = vld [vmem:[#allocation5 + $0x98] sm:$0xff] }
 0x128   :  { %v459_v12 = vld [vmem:[#allocation5 + $0xc50] sm:$0xff]  ;;  %1031 = vmatpush.msrb.mxu1 %v395_v11  ;;  %v148_v11 = vld [vmem:[#allocation5 + $0x298] sm:$0xff] }
 0x129   :  { %v527_v15 = vld [vmem:[#allocation5 + $0xe70] sm:$0xff]  ;;  %1051 = vmatpush.msrb.mxu2 %v459_v12  ;;  %v212_v12 = vld [vmem:[#allocation5 + $0x498] sm:$0xff] }
 0x12a   :  { %v327_v17 = vld [vmem:[#allocation5 + $0x830] sm:$0xff]  ;;  %1070 = vmatpush.msrb.mxu3 %v527_v15  ;;  %v280_v15 = vld [vmem:[#allocation5 + $0x6b8] sm:$0xff] }
 0x12b   :  { %v391_v20 = vld [vmem:[#allocation5 + $0xa30] sm:$0xff]  ;;  %1012 = vmatpush.msrb.mxu0 %v327_v17  ;;  %v80_v17 = vld [vmem:[#allocation5 + $0x78] sm:$0xff] }
 0x12c   :  { %v455_v21 = vld [vmem:[#allocation5 + $0xc30] sm:$0xff]  ;;  %1032 = vmatpush.msrb.mxu1 %v391_v20  ;;  %v144_v20 = vld [vmem:[#allocation5 + $0x278] sm:$0xff] }
 0x12d   :  { %v523_v22 = vld [vmem:[#allocation5 + $0xe50] sm:$0xff]  ;;  %1052 = vmatpush.msrb.mxu2 %v455_v21  ;;  %v208_v21 = vld [vmem:[#allocation5 + $0x478] sm:$0xff] }
 0x12e   :  { %v1846_v23 = vld.sshfl [vmem:[#allocation1 + $0x8] sm:$0xff pattern:$0x73625140]  ;;  %1071 = vmatpush.msrb.mxu3 %v523_v22  ;;  %v276_v22 = vld [vmem:[#allocation5 + $0x698] sm:$0xff] }
 0x12f   :  { %954 = vmatmul.f32.vlgmr.msra.gmra.mxu1 %v1846_v23  ;;  %v323_v25 = vld [vmem:[#allocation5 + $0x810] sm:$0xff] }
 0x130   :  { %v387_v26 = vld [vmem:[#allocation5 + $0xa10] sm:$0xff]  ;;  %1013 = vmatpush.msrb.mxu0 %v323_v25  ;;  %v76_v25 = vld [vmem:[#allocation5 + $0x58] sm:$0xff] }
 0x131   :  { %v451_v27 = vld [vmem:[#allocation5 + $0xc10] sm:$0xff]  ;;  %1033 = vmatpush.msrb.mxu1 %v387_v26  ;;  %1014 = vmatmul.f32.vlgmr.msrb.gmra.mxu0 %v1852_v4  ;;  %v140_v26 = vld [vmem:[#allocation5 + $0x258] sm:$0xff] }
 0x132   :  { %v519_v28 = vld [vmem:[#allocation5 + $0xe30] sm:$0xff]  ;;  %1053 = vmatpush.msrb.mxu2 %v451_v27  ;;  %1078 = vmatpush.msra.mxu0 %v128_v57  ;;  %v204_v27 = vld [vmem:[#allocation5 + $0x458] sm:$0xff] }
 0x133   :  { %1072 = vmatpush.msrb.mxu3 %v519_v28  ;;  %v515_v31 = vld [vmem:[#allocation5 + $0xe10] sm:$0xff]  ;;  %1054 = vmatmul.f32.vlgmr.msrb.gmra.mxu2 %v1849_v62  ;;  %v272_v28 = vld [vmem:[#allocation5 + $0x678] sm:$0xff] }
 0x134   :  { %1098 = vmatpush.msra.mxu1 %v192_v29  ;;  %1118 = vmatpush.msra.mxu2 %v256_v30  ;;  %v1858_v40 = vld.sshfl [vmem:[#allocation1 + $0x28] sm:$0xff pattern:$0x73625140]  ;;  %v72_v57 = vld [vmem:[#allocation5 + $0x38] sm:$0xff] }
 0x135   :  { %1073 = vmatpush.msrb.mxu3 %v515_v31  ;;  %1079 = vmatpush.msra.mxu0 %v124_v63  ;;  %v136_v29 = vld [vmem:[#allocation5 + $0x238] sm:$0xff] }
 0x136   :  { %1074 = vmatmul.f32.vlgmr.msrb.gmra.mxu3 %v1855_v35  ;;  %1099 = vmatpush.msra.mxu1 %v188_v32  ;;  %v200_v30 = vld [vmem:[#allocation5 + $0x438] sm:$0xff] }
 0x137   :  { %1119 = vmatpush.msra.mxu2 %v252_v33  ;;  %1138 = vmatpush.msra.mxu3 %v320_v34  ;;  %v268_v31 = vld [vmem:[#allocation5 + $0x658] sm:$0xff] }
 0x138   :  { %1034 = vmatmul.f32.vlgmr.msrb.gmra.mxu1 %v1858_v40  ;;  %1080 = vmatpush.msra.mxu0 %v120_v36  ;;  %v68_v63 = vld [vmem:[#allocation5 + $0x18] sm:$0xff] }
 0x139   :  { %1100 = vmatpush.msra.mxu1 %v184_v37  ;;  %1120 = vmatpush.msra.mxu2 %v248_v38  ;;  %v132_v32 = vld [vmem:[#allocation5 + $0x218] sm:$0xff] }
 0x13a   :  { %1139 = vmatpush.msra.mxu3 %v316_v39  ;;  %1081 = vmatpush.msra.mxu0 %v116_v13  ;;  %v196_v33 = vld [vmem:[#allocation5 + $0x418] sm:$0xff] }
 0x13b   :  { %1101 = vmatpush.msra.mxu1 %v180_v41  ;;  %1121 = vmatpush.msra.mxu2 %v244_v42  ;;  %v264_v34 = vld [vmem:[#allocation5 + $0x638] sm:$0xff] }
 0x13c   :  { %1140 = vmatpush.msra.mxu3 %v312_v43  ;;  %1082 = vmatpush.msra.mxu0 %v112_v18  ;;  %v384_v36 = vld [vmem:[#allocation5 + $0x9f8] sm:$0xff] }
 0x13d   :  { %1102 = vmatpush.msra.mxu1 %v176_v19  ;;  %1122 = vmatpush.msra.mxu2 %v240_v44  ;;  %v448_v37 = vld [vmem:[#allocation5 + $0xbf8] sm:$0xff] }
 0x13e   :  { %1141 = vmatpush.msra.mxu3 %v308_v45  ;;  %1083 = vmatpush.msra.mxu0 %v108_v46  ;;  %v512_v38 = vld [vmem:[#allocation5 + $0xdf8] sm:$0xff] }
 0x13f   :  { %1103 = vmatpush.msra.mxu1 %v172_v47  ;;  %1123 = vmatpush.msra.mxu2 %v236_v24  ;;  %v260_v39 = vld [vmem:[#allocation5 + $0x618] sm:$0xff] }
 0x140   :  { %1142 = vmatpush.msra.mxu3 %v304_v48  ;;  %1084 = vmatpush.msra.mxu0 %v104_v49  ;;  %v380_v13 = vld [vmem:[#allocation5 + $0x9d8] sm:$0xff] }
 0x141   :  { %1104 = vmatpush.msra.mxu1 %v168_v50  ;;  %1124 = vmatpush.msra.mxu2 %v232_v51  ;;  %v444_v41 = vld [vmem:[#allocation5 + $0xbd8] sm:$0xff] }
 0x142   :  { %1143 = vmatpush.msra.mxu3 %v300_v52  ;;  %1085 = vmatpush.msra.mxu0 %v100_v53  ;;  %v508_v42 = vld [vmem:[#allocation5 + $0xdd8] sm:$0xff] }
 0x143   :  { %1105 = vmatpush.msra.mxu1 %v164_v54  ;;  %1125 = vmatpush.msra.mxu2 %v228_v55  ;;  %v576_v43 = vld [vmem:[#allocation5 + $0xff8] sm:$0xff] }
 0x144   :  { %1144 = vmatpush.msra.mxu3 %v296_v56  ;;  %1086 = vmatpush.msra.mxu0 %v96_v58  ;;  %v376_v18 = vld [vmem:[#allocation5 + $0x9b8] sm:$0xff] }
 0x145   :  { %1106 = vmatpush.msra.mxu1 %v160_v59  ;;  %1126 = vmatpush.msra.mxu2 %v224_v60  ;;  %v440_v19 = vld [vmem:[#allocation5 + $0xbb8] sm:$0xff] }
 0x146   :  { %1145 = vmatpush.msra.mxu3 %v292_v61  ;;  %1087 = vmatpush.msra.mxu0 %v92_v0  ;;  %v504_v44 = vld [vmem:[#allocation5 + $0xdb8] sm:$0xff] }
 0x147   :  { %1107 = vmatpush.msra.mxu1 %v156_v1  ;;  %1127 = vmatpush.msra.mxu2 %v220_v2  ;;  %v572_v45 = vld [vmem:[#allocation5 + $0xfd8] sm:$0xff] }
 0x148   :  { %1146 = vmatpush.msra.mxu3 %v288_v3  ;;  %1088 = vmatpush.msra.mxu0 %v88_v5  ;;  %v372_v46 = vld [vmem:[#allocation5 + $0x998] sm:$0xff]  ;;  %v1861_v5 = vpop.f32.mrf.mxu1 }
 0x149   :  { %1108 = vmatpush.msra.mxu1 %v152_v6  ;;  %1128 = vmatpush.msra.mxu2 %v216_v7  ;;  %v436_v47 = vld [vmem:[#allocation5 + $0xb98] sm:$0xff] }
 0x14a   :  { %1147 = vmatpush.msra.mxu3 %v284_v8  ;;  %1089 = vmatpush.msra.mxu0 %v84_v10  ;;  %v500_v24 = vld [vmem:[#allocation5 + $0xd98] sm:$0xff] }
 0x14b   :  { %1109 = vmatpush.msra.mxu1 %v148_v11  ;;  %1129 = vmatpush.msra.mxu2 %v212_v12  ;;  %v568_v48 = vld [vmem:[#allocation5 + $0xfb8] sm:$0xff]  ;;  %v1863_v11 = vpop.f32.mrf.mxu0 }
 0x14c   :  { %1148 = vmatpush.msra.mxu3 %v280_v15  ;;  %1090 = vmatpush.msra.mxu0 %v80_v17  ;;  %v368_v49 = vld [vmem:[#allocation5 + $0x978] sm:$0xff] }
 0x14d   :  { %1110 = vmatpush.msra.mxu1 %v144_v20  ;;  %1130 = vmatpush.msra.mxu2 %v208_v21  ;;  %v432_v50 = vld [vmem:[#allocation5 + $0xb78] sm:$0xff]  ;;  %v1865_v21 = vpop.f32.mrf.mxu2 }
 0x14e   :  { %1149 = vmatpush.msra.mxu3 %v276_v22  ;;  %1091 = vmatpush.msra.mxu0 %v76_v25  ;;  %v496_v51 = vld [vmem:[#allocation5 + $0xd78] sm:$0xff] }
 0x14f   :  { %1111 = vmatpush.msra.mxu1 %v140_v26  ;;  %1131 = vmatpush.msra.mxu2 %v204_v27  ;;  %v564_v52 = vld [vmem:[#allocation5 + $0xf98] sm:$0xff] }
 0x150   :  { %1150 = vmatpush.msra.mxu3 %v272_v28  ;;  %1092 = vmatpush.msra.mxu0 %v72_v57  ;;  %v364_v53 = vld [vmem:[#allocation5 + $0x958] sm:$0xff] }
 0x151   :  { %1112 = vmatpush.msra.mxu1 %v136_v29  ;;  %1132 = vmatpush.msra.mxu2 %v200_v30  ;;  %v428_v54 = vld [vmem:[#allocation5 + $0xb58] sm:$0xff]  ;;  %v1867_v30 = vpop.f32.mrf.mxu3 }
 0x152   :  { %1151 = vmatpush.msra.mxu3 %v268_v31  ;;  %1093 = vmatpush.msra.mxu0 %v68_v63  ;;  %v492_v55 = vld [vmem:[#allocation5 + $0xd58] sm:$0xff] }
 0x153   :  { %1113 = vmatpush.msra.mxu1 %v132_v32  ;;  %1133 = vmatpush.msra.mxu2 %v196_v33  ;;  %v560_v56 = vld [vmem:[#allocation5 + $0xf78] sm:$0xff]  ;;  %v1870_v32 = vpop.f32.mrf.mxu1 }
 0x154   :  { %1152 = vmatpush.msra.mxu3 %v264_v34  ;;  %1158 = vmatpush.msrb.mxu0 %v384_v36  ;;  %v360_v58 = vld [vmem:[#allocation5 + $0x938] sm:$0xff] }
 0x155   :  { %1178 = vmatpush.msrb.mxu1 %v448_v37  ;;  %1198 = vmatpush.msrb.mxu2 %v512_v38  ;;  %v424_v59 = vld [vmem:[#allocation5 + $0xb38] sm:$0xff]  ;;  %v1873_v37 = vpop.f32.mrf.mxu0 }
 0x156   :  { %1153 = vmatpush.msra.mxu3 %v260_v39  ;;  %1159 = vmatpush.msrb.mxu0 %v380_v13  ;;  %v488_v60 = vld [vmem:[#allocation5 + $0xd38] sm:$0xff] }
 0x157   :  { %1179 = vmatpush.msrb.mxu1 %v444_v41  ;;  %1199 = vmatpush.msrb.mxu2 %v508_v42  ;;  %v556_v61 = vld [vmem:[#allocation5 + $0xf58] sm:$0xff]  ;;  %v1876_v41 = vpop.f32.mrf.mxu2 }
 0x158   :  { %1218 = vmatpush.msrb.mxu3 %v576_v43  ;;  %1160 = vmatpush.msrb.mxu0 %v376_v18  ;;  %v356_v0 = vld [vmem:[#allocation5 + $0x918] sm:$0xff] }
 0x159   :  { %1180 = vmatpush.msrb.mxu1 %v440_v19  ;;  %1200 = vmatpush.msrb.mxu2 %v504_v44  ;;  %v420_v1 = vld [vmem:[#allocation5 + $0xb18] sm:$0xff] }
 0x15a   :  { %1219 = vmatpush.msrb.mxu3 %v572_v45  ;;  %1161 = vmatpush.msrb.mxu0 %v372_v46  ;;  %v484_v2 = vld [vmem:[#allocation5 + $0xd18] sm:$0xff]  ;;  %v1879_v46 = vpop.f32.mrf.mxu3 }
 0x15b   :  { %1181 = vmatpush.msrb.mxu1 %v436_v47  ;;  %1201 = vmatpush.msrb.mxu2 %v500_v24  ;;  %v552_v3 = vld [vmem:[#allocation5 + $0xf38] sm:$0xff]  ;;  %v795_v47 = vpop.f32.mrf.mxu1  ;;  %v1312_v24 = vld [vmem:[#allocation7 + $0x1f0] sm:$0xff] }
 0x15c   :  { %1220 = vmatpush.msrb.mxu3 %v568_v48  ;;  %1162 = vmatpush.msrb.mxu0 %v368_v49  ;;  %v352_v6 = vld [vmem:[#allocation5 + $0x8f8] sm:$0xff]  ;;  %v636_v48 = vadd.f32 %v1861_v5, %v1863_v11  ;;  %v1338_v5 = vld [vmem:[#allocation7 + $0x2c0] sm:$0xff]  ;;  %v1268_v11 = vld [vmem:[#allocation7 + $0x90] sm:$0xff] }
 0x15d   :  { %1182 = vmatpush.msrb.mxu1 %v432_v50  ;;  %1202 = vmatpush.msrb.mxu2 %v496_v51  ;;  %v416_v7 = vld [vmem:[#allocation5 + $0xaf8] sm:$0xff]  ;;  %v775_v49 = vpop.f32.mrf.mxu0 }
 0x15e   :  { %1221 = vmatpush.msrb.mxu3 %v564_v52  ;;  %1163 = vmatpush.msrb.mxu0 %v364_v53  ;;  %v480_v8 = vld [vmem:[#allocation5 + $0xcf8] sm:$0xff]  ;;  %v796_v51 = vadd.f32 %v795_v47, %v775_v49  ;;  %v1278_v52 = vld [vmem:[#allocation7 + $0xe0] sm:$0xff]  ;;  %v1320_v47 = vld [vmem:[#allocation7 + $0x230] sm:$0xff] }
 0x15f   :  { %1183 = vmatpush.msrb.mxu1 %v428_v54  ;;  %1203 = vmatpush.msrb.mxu2 %v492_v55  ;;  %v548_v10 = vld [vmem:[#allocation5 + $0xf18] sm:$0xff]  ;;  %v1310_v53 = vld [vmem:[#allocation7 + $0x1e0] sm:$0xff]  ;;  %v815_v54 = vpop.f32.mrf.mxu2  ;;  %v1344_v55 = vld [vmem:[#allocation7 + $0x2f0] sm:$0xff] }
 0x160   :  { %1222 = vmatpush.msrb.mxu3 %v560_v56  ;;  %1164 = vmatpush.msrb.mxu0 %v360_v58  ;;  %v348_v12 = vld [vmem:[#allocation5 + $0x8d8] sm:$0xff]  ;;  %v1276_v56 = vld [vmem:[#allocation7 + $0xd0] sm:$0xff]  ;;  %v656_v58 = vadd.f32 %v1865_v21, %v636_v48  ;;  %v1266_v21 = vld [vmem:[#allocation7 + $0x80] sm:$0xff] }
 0x161   :  { %1184 = vmatpush.msrb.mxu1 %v424_v59  ;;  %1204 = vmatpush.msrb.mxu2 %v488_v60  ;;  %v412_v15 = vld [vmem:[#allocation5 + $0xad8] sm:$0xff]  ;;  %v1308_v59 = vld [vmem:[#allocation7 + $0x1d0] sm:$0xff]  ;;  %v1274_v60 = vld [vmem:[#allocation7 + $0xc0] sm:$0xff] }
 0x162   :  { %1223 = vmatpush.msrb.mxu3 %v556_v61  ;;  %1165 = vmatpush.msrb.mxu0 %v356_v0  ;;  %v476_v17 = vld [vmem:[#allocation5 + $0xcd8] sm:$0xff]  ;;  %v835_v61 = vpop.f32.mrf.mxu3  ;;  %v1306_v0 = vld [vmem:[#allocation7 + $0x1c0] sm:$0xff]  ;;  %v1284_v48 = vld [vmem:[#allocation7 + $0x110] sm:$0xff] }
 0x163   :  { %1185 = vmatpush.msrb.mxu1 %v420_v1  ;;  %1205 = vmatpush.msrb.mxu2 %v484_v2  ;;  %v544_v20 = vld [vmem:[#allocation5 + $0xef8] sm:$0xff]  ;;  %v1340_v1 = vld [vmem:[#allocation7 + $0x2d0] sm:$0xff]  ;;  %v1318_v49 = vld [vmem:[#allocation7 + $0x220] sm:$0xff] }
 0x164   :  { %1224 = vmatpush.msrb.mxu3 %v552_v3  ;;  %1166 = vmatpush.msrb.mxu0 %v352_v6  ;;  %v344_v22 = vld [vmem:[#allocation5 + $0x8b8] sm:$0xff]  ;;  %v1272_v2 = vld [vmem:[#allocation7 + $0xb0] sm:$0xff]  ;;  %v1270_v6 = vld [vmem:[#allocation7 + $0xa0] sm:$0xff] }
 0x165   :  { %1186 = vmatpush.msrb.mxu1 %v416_v7  ;;  %1206 = vmatpush.msrb.mxu2 %v480_v8  ;;  %v408_v25 = vld [vmem:[#allocation5 + $0xab8] sm:$0xff]  ;;  %v1304_v3 = vld [vmem:[#allocation7 + $0x1b0] sm:$0xff]  ;;  %v855_v7 = vpop.f32.mrf.mxu0  ;;  %v1302_v8 = vld [vmem:[#allocation7 + $0x1a0] sm:$0xff] }
 0x166   :  { %1225 = vmatpush.msrb.mxu3 %v548_v10  ;;  %1167 = vmatpush.msrb.mxu0 %v348_v12  ;;  %v472_v26 = vld [vmem:[#allocation5 + $0xcb8] sm:$0xff]  ;;  %v1336_v10 = vld [vmem:[#allocation7 + $0x2b0] sm:$0xff] }
 0x167   :  { %1187 = vmatpush.msrb.mxu1 %v412_v15  ;;  %v540_v27 = vld [vmem:[#allocation5 + $0xed8] sm:$0xff]  ;;  %1207 = vmatpush.msrb.mxu2 %v476_v17  ;;  %v1300_v15 = vld [vmem:[#allocation7 + $0x190] sm:$0xff]  ;;  %v1334_v17 = vld [vmem:[#allocation7 + $0x2a0] sm:$0xff] }
 0x168   :  { %1226 = vmatpush.msrb.mxu3 %v544_v20  ;;  %v340_v28 = vld [vmem:[#allocation5 + $0x898] sm:$0xff]  ;;  %1168 = vmatpush.msrb.mxu0 %v344_v22  ;;  %v875_v22 = vpop.f32.mrf.mxu1 }
 0x169   :  { %1188 = vmatpush.msrb.mxu1 %v408_v25  ;;  %v404_v57 = vld [vmem:[#allocation5 + $0xa98] sm:$0xff]  ;;  %1208 = vmatpush.msrb.mxu2 %v472_v26  ;;  %v1298_v25 = vld [vmem:[#allocation7 + $0x180] sm:$0xff]  ;;  %v1332_v26 = vld [vmem:[#allocation7 + $0x290] sm:$0xff] }
 0x16a   :  { %v468_v29 = vld [vmem:[#allocation5 + $0xc98] sm:$0xff]  ;;  %1227 = vmatpush.msrb.mxu3 %v540_v27  ;;  %1134 = vmatmul.f32.vlgmr.msra.gmra.mxu2 %v1837_v9  ;;  %v1264_v27 = vld [vmem:[#allocation7 + $0x70] sm:$0xff] }
 0x16b   :  { %v536_v31 = vld [vmem:[#allocation5 + $0xeb8] sm:$0xff]  ;;  %1169 = vmatpush.msrb.mxu0 %v340_v28  ;;  %1189 = vmatpush.msrb.mxu1 %v404_v57  ;;  %v1296_v57 = vld [vmem:[#allocation7 + $0x170] sm:$0xff] }
 0x16c   :  { %v336_v63 = vld [vmem:[#allocation5 + $0x878] sm:$0xff]  ;;  %1209 = vmatpush.msrb.mxu2 %v468_v29  ;;  %1228 = vmatpush.msrb.mxu3 %v536_v31  ;;  %v1330_v29 = vld [vmem:[#allocation7 + $0x280] sm:$0xff] }
 0x16d   :  { %v400_v33 = vld [vmem:[#allocation5 + $0xa78] sm:$0xff]  ;;  %1094 = vmatmul.f32.vlgmr.msra.gmra.mxu0 %v1840_v14  ;;  %1154 = vmatmul.f32.vlgmr.msra.gmra.mxu3 %v1843_v16  ;;  %v1262_v31 = vld [vmem:[#allocation7 + $0x60] sm:$0xff] }
 0x16e   :  { %v464_v34 = vld [vmem:[#allocation5 + $0xc78] sm:$0xff]  ;;  %1170 = vmatpush.msrb.mxu0 %v336_v63  ;;  %1190 = vmatpush.msrb.mxu1 %v400_v33  ;;  %v895_v63 = vpop.f32.mrf.mxu2  ;;  %v1294_v33 = vld [vmem:[#allocation7 + $0x160] sm:$0xff] }
 0x16f   :  { %v532_v36 = vld [vmem:[#allocation5 + $0xe98] sm:$0xff]  ;;  %1210 = vmatpush.msrb.mxu2 %v464_v34  ;;  %1114 = vmatmul.f32.vlgmr.msra.gmra.mxu1 %v1846_v23  ;;  %v1280_v23 = vld [vmem:[#allocation7 + $0xf0] sm:$0xff] }
 0x170   :  { %v332_v38 = vld [vmem:[#allocation5 + $0x858] sm:$0xff]  ;;  %1229 = vmatpush.msrb.mxu3 %v532_v36  ;;  %v1328_v34 = vld [vmem:[#allocation7 + $0x270] sm:$0xff] }
 0x171   :  { %v396_v39 = vld [vmem:[#allocation5 + $0xa58] sm:$0xff]  ;;  %1171 = vmatpush.msrb.mxu0 %v332_v38  ;;  %v1260_v36 = vld [vmem:[#allocation7 + $0x50] sm:$0xff] }
 0x172   :  { %v460_v9 = vld [vmem:[#allocation5 + $0xc58] sm:$0xff]  ;;  %1191 = vmatpush.msrb.mxu1 %v396_v39  ;;  %v1292_v38 = vld [vmem:[#allocation7 + $0x150] sm:$0xff]  ;;  %v1326_v39 = vld [vmem:[#allocation7 + $0x260] sm:$0xff] }
 0x173   :  { %v528_v13 = vld [vmem:[#allocation5 + $0xe78] sm:$0xff]  ;;  %1211 = vmatpush.msrb.mxu2 %v460_v9  ;;  %v1258_v9 = vld [vmem:[#allocation7 + $0x40] sm:$0xff] }
 0x174   :  { %v328_v42 = vld [vmem:[#allocation5 + $0x838] sm:$0xff]  ;;  %1230 = vmatpush.msrb.mxu3 %v528_v13  ;;  %v915_v13 = vpop.f32.mrf.mxu3 }
 0x175   :  { %v392_v43 = vld [vmem:[#allocation5 + $0xa38] sm:$0xff]  ;;  %1172 = vmatpush.msrb.mxu0 %v328_v42  ;;  %v1290_v42 = vld [vmem:[#allocation7 + $0x140] sm:$0xff] }
 0x176   :  { %v456_v14 = vld [vmem:[#allocation5 + $0xc38] sm:$0xff]  ;;  %1192 = vmatpush.msrb.mxu1 %v392_v43  ;;  %v1324_v43 = vld [vmem:[#allocation7 + $0x250] sm:$0xff] }
 0x177   :  { %v524_v18 = vld [vmem:[#allocation5 + $0xe58] sm:$0xff]  ;;  %1212 = vmatpush.msrb.mxu2 %v456_v14  ;;  %v1256_v14 = vld [vmem:[#allocation7 + $0x30] sm:$0xff] }
 0x178   :  { %v324_v16 = vld [vmem:[#allocation5 + $0x818] sm:$0xff]  ;;  %1231 = vmatpush.msrb.mxu3 %v524_v18 }
 0x179   :  { %v388_v19 = vld [vmem:[#allocation5 + $0xa18] sm:$0xff]  ;;  %1173 = vmatpush.msrb.mxu0 %v324_v16  ;;  %v1288_v16 = vld [vmem:[#allocation7 + $0x130] sm:$0xff] }
 0x17a   :  { %v452_v44 = vld [vmem:[#allocation5 + $0xc18] sm:$0xff]  ;;  %1193 = vmatpush.msrb.mxu1 %v388_v19  ;;  %1174 = vmatmul.f32.vlgmr.msrb.gmra.mxu0 %v1852_v4  ;;  %v1342_v4 = vld [vmem:[#allocation7 + $0x2e0] sm:$0xff] }
 0x17b   :  { %v520_v45 = vld [vmem:[#allocation5 + $0xe38] sm:$0xff]  ;;  %1213 = vmatpush.msrb.mxu2 %v452_v44  ;;  %1378 = vmatpush.msra.mxu0 %v1280_v23  ;;  %v1322_v19 = vld [vmem:[#allocation7 + $0x240] sm:$0xff]  ;;  %v1252_v23 = vld [vmem:[#allocation7 + $0x10] sm:$0xff] }
 0x17c   :  { %1232 = vmatpush.msrb.mxu3 %v520_v45  ;;  %v516_v50 = vld [vmem:[#allocation5 + $0xe18] sm:$0xff]  ;;  %1214 = vmatmul.f32.vlgmr.msrb.gmra.mxu2 %v1849_v62  ;;  %v816_v62 = vadd.f32 %v815_v54, %v796_v51  ;;  %v1254_v44 = vld [vmem:[#allocation7 + $0x20] sm:$0xff] }
 0x17d   :  { %1398 = vmatpush.msra.mxu1 %v1312_v24  ;;  %1379 = vmatpush.msra.mxu0 %v1278_v52  ;;  %v1286_v45 = vld [vmem:[#allocation7 + $0x120] sm:$0xff]  ;;  %v1281_v52 = vld [vmem:[#allocation7 + $0xf8] sm:$0xff] }
 0x17e   :  { %1233 = vmatpush.msrb.mxu3 %v516_v50  ;;  %1194 = vmatmul.f32.vlgmr.msrb.gmra.mxu1 %v1858_v40  ;;  %v676_v40 = vadd.f32 %v1867_v30, %v656_v58  ;;  %v1282_v51 = vld [vmem:[#allocation7 + $0x100] sm:$0xff]  ;;  %v1313_v54 = vld [vmem:[#allocation7 + $0x1f8] sm:$0xff]  ;;  %v1279_v58 = vld [vmem:[#allocation7 + $0xe8] sm:$0xff] }
 0x17f   :  { %1234 = vmatmul.f32.vlgmr.msrb.gmra.mxu3 %v1855_v35  ;;  %1399 = vmatpush.msra.mxu1 %v1310_v53  ;;  %v836_v35 = vadd.f32 %v835_v61, %v816_v62  ;;  %v1277_v62 = vld [vmem:[#allocation7 + $0xd8] sm:$0xff] }
 0x180   :  { %1418 = vmatpush.msra.mxu2 %v1344_v55  ;;  %1380 = vmatpush.msra.mxu0 %v1276_v56  ;;  %v696_v12 = vadd.f32 %v1873_v37, %v676_v40  ;;  %v1316_v55 = vld [vmem:[#allocation7 + $0x210] sm:$0xff]  ;;  %v1309_v61 = vld [vmem:[#allocation7 + $0x1d8] sm:$0xff] }
 0x181   :  { %1400 = vmatpush.msra.mxu1 %v1308_v59  ;;  %v856_v20 = vadd.f32 %v855_v7, %v836_v35  ;;  %v1311_v59 = vld [vmem:[#allocation7 + $0x1e8] sm:$0xff]  ;;  %v1273_v40 = vld [vmem:[#allocation7 + $0xb8] sm:$0xff] }
 0x182   :  { %1419 = vmatpush.msra.mxu2 %v1342_v4  ;;  %1381 = vmatpush.msra.mxu0 %v1274_v60  ;;  %v716_v28 = vadd.f32 %v1870_v32, %v696_v12  ;;  %v1314_v4 = vld [vmem:[#allocation7 + $0x200] sm:$0xff]  ;;  %v1345_v60 = vld [vmem:[#allocation7 + $0x2f8] sm:$0xff]  ;;  %v1271_v35 = vld [vmem:[#allocation7 + $0xa8] sm:$0xff] }
 0x183   :  { %1401 = vmatpush.msra.mxu1 %v1306_v0  ;;  %v876_v30 = vadd.f32 %v875_v22, %v856_v20  ;;  %v1275_v0 = vld [vmem:[#allocation7 + $0xc8] sm:$0xff]  ;;  %v1301_v12 = vld [vmem:[#allocation7 + $0x198] sm:$0xff] }
 0x184   :  { %1420 = vmatpush.msra.mxu2 %v1340_v1  ;;  %1382 = vmatpush.msra.mxu0 %v1272_v2  ;;  %v736_v37 = vadd.f32 %v1876_v41, %v716_v28  ;;  %v1343_v1 = vld [vmem:[#allocation7 + $0x2e8] sm:$0xff]  ;;  %v1333_v22 = vld [vmem:[#allocation7 + $0x298] sm:$0xff]  ;;  %v1374_v28 = vld [vmem:[#allocation7 + $0x3e0] sm:$0xff] }
 0x185   :  { %1402 = vmatpush.msra.mxu1 %v1304_v3  ;;  %v896_v32 = vadd.f32 %v895_v63, %v876_v30  ;;  %v1307_v2 = vld [vmem:[#allocation7 + $0x1c8] sm:$0xff]  ;;  %v1341_v3 = vld [vmem:[#allocation7 + $0x2d8] sm:$0xff]  ;;  %v1372_v30 = vld [vmem:[#allocation7 + $0x3d0] sm:$0xff] }
 0x186   :  { %1421 = vmatpush.msra.mxu2 %v1338_v5  ;;  %1383 = vmatpush.msra.mxu0 %v1270_v6  ;;  %v756_v18 = vadd.f32 %v1879_v46, %v736_v37  ;;  %v1250_v46 = vld [vmem:[#allocation7] sm:$0xff]  ;;  %v1305_v5 = vld [vmem:[#allocation7 + $0x1b8] sm:$0xff]  ;;  %v1339_v6 = vld [vmem:[#allocation7 + $0x2c8] sm:$0xff] }
 0x187   :  { %1403 = vmatpush.msra.mxu1 %v1302_v8  ;;  %v916_v41 = vadd.f32 %v915_v13, %v896_v32  ;;  %v1303_v7 = vld [vmem:[#allocation7 + $0x1a8] sm:$0xff]  ;;  %v1376_v8 = vld [vmem:[#allocation7 + $0x3f0] sm:$0xff]  ;;  %v1329_v63 = vld [vmem:[#allocation7 + $0x278] sm:$0xff] }
 0x188   :  { %1422 = vmatpush.msra.mxu2 %v1336_v10  ;;  %1384 = vmatpush.msra.mxu0 %v1268_v11  ;;  %v1242_v24 = vmul.f32 0.2, %v756_v18  ;;  %vm1238_vm0 = vcmp.ge.f32.partialorder %v756_v18, 0.0  ;;  %v1269_v10 = vld [vmem:[#allocation7 + $0x98] sm:$0xff]  ;;  %v1299_v20 = vld [vmem:[#allocation7 + $0x188] sm:$0xff]  ;;  %v1368_v13 = vld [vmem:[#allocation7 + $0x3b0] sm:$0xff] }
 0x189   :  { %1404 = vmatpush.msra.mxu1 %v1300_v15  ;;  %v1243_v50 = vmul.f32 0.2, %v916_v41  ;;  %vm1239_vm1 = vcmp.ge.f32.partialorder %v916_v41, 0.0  ;;  %v1337_v11 = vld [vmem:[#allocation7 + $0x2b8] sm:$0xff]  ;;  %1438 = vmatpush.msra.mxu3 %v1376_v8  ;;  %v1267_v15 = vld [vmem:[#allocation7 + $0x88] sm:$0xff]  ;;  %v1346_v8 = vld [vmem:[#allocation7 + $0x300] sm:$0xff] }
 0x18a   :  { %1423 = vmatpush.msra.mxu2 %v1334_v17  ;;  %1385 = vmatpush.msra.mxu0 %v1266_v21  ;;  %v1893_v53 = vsel %vm1238_vm0, %v756_v18, %v1242_v24  ;;  %v1335_v17 = vld [vmem:[#allocation7 + $0x2a8] sm:$0xff]  ;;  %v1265_v21 = vld [vmem:[#allocation7 + $0x78] sm:$0xff] }
 0x18b   :  { %1405 = vmatpush.msra.mxu1 %v1298_v25  ;;  %v1896_v56 = vsel %vm1239_vm1, %v916_v41, %v1243_v50  ;;  %v1297_v25 = vld [vmem:[#allocation7 + $0x178] sm:$0xff]  ;;  %1439 = vmatpush.msra.mxu3 %v1374_v28  ;;  %v995_v41 = vpop.f32.mrf.mxu3  ;;  %v1355_v28 = vld [vmem:[#allocation7 + $0x348] sm:$0xff] }
 0x18c   :  { %1424 = vmatpush.msra.mxu2 %v1332_v26  ;;  %1386 = vmatpush.msra.mxu0 %v1264_v27  ;;  %v1263_v26 = vld [vmem:[#allocation7 + $0x68] sm:$0xff]  ;;  %v1253_v24 = vld [vmem:[#allocation7 + $0x18] sm:$0xff] }
 0x18d   :  { %1406 = vmatpush.msra.mxu1 %v1296_v57  ;;  %v1331_v27 = vld [vmem:[#allocation7 + $0x288] sm:$0xff]  ;;  %1440 = vmatpush.msra.mxu3 %v1372_v30  ;;  %v1349_v30 = vld [vmem:[#allocation7 + $0x318] sm:$0xff] }
 0x18e   :  { %1425 = vmatpush.msra.mxu2 %v1330_v29  ;;  %1387 = vmatpush.msra.mxu0 %v1262_v31  ;;  %v1295_v57 = vld [vmem:[#allocation7 + $0x168] sm:$0xff]  ;;  %v935_v29 = vpop.f32.mrf.mxu0  ;;  %v1261_v31 = vld [vmem:[#allocation7 + $0x58] sm:$0xff] }
 0x18f   :  { %1407 = vmatpush.msra.mxu1 %v1294_v33  ;;  %v1293_v33 = vld [vmem:[#allocation7 + $0x158] sm:$0xff] }
 0x190   :  { %1426 = vmatpush.msra.mxu2 %v1328_v34  ;;  %1388 = vmatpush.msra.mxu0 %v1260_v36  ;;  %v1370_v34 = vld [vmem:[#allocation7 + $0x3c0] sm:$0xff]  ;;  %v1259_v36 = vld [vmem:[#allocation7 + $0x48] sm:$0xff] }
 0x191   :  { %1408 = vmatpush.msra.mxu1 %v1292_v38  ;;  %v1327_v38 = vld [vmem:[#allocation7 + $0x268] sm:$0xff]  ;;  %1441 = vmatpush.msra.mxu3 %v1370_v34 }
 0x192   :  { %1427 = vmatpush.msra.mxu2 %v1326_v39  ;;  %1389 = vmatpush.msra.mxu0 %v1258_v9  ;;  %v1291_v39 = vld [vmem:[#allocation7 + $0x148] sm:$0xff]  ;;  %v975_v9 = vpop.f32.mrf.mxu2 }
 0x193   :  { %1409 = vmatpush.msra.mxu1 %v1290_v42  ;;  %v1257_v42 = vld [vmem:[#allocation7 + $0x38] sm:$0xff]  ;;  %1442 = vmatpush.msra.mxu3 %v1368_v13 }
 0x194   :  { %1428 = vmatpush.msra.mxu2 %v1324_v43  ;;  %1390 = vmatpush.msra.mxu0 %v1256_v14  ;;  %v1325_v43 = vld [vmem:[#allocation7 + $0x258] sm:$0xff] }
 0x195   :  { %1410 = vmatpush.msra.mxu1 %v1288_v16  ;;  %v1289_v14 = vld [vmem:[#allocation7 + $0x138] sm:$0xff]  ;;  %v1366_v16 = vld [vmem:[#allocation7 + $0x3a0] sm:$0xff] }
 0x196   :  { %1429 = vmatpush.msra.mxu2 %v1322_v19  ;;  %1391 = vmatpush.msra.mxu0 %v1254_v44  ;;  %v1255_v19 = vld [vmem:[#allocation7 + $0x28] sm:$0xff] }
 0x197   :  { %1411 = vmatpush.msra.mxu1 %v1286_v45  ;;  %v1323_v44 = vld [vmem:[#allocation7 + $0x248] sm:$0xff]  ;;  %1443 = vmatpush.msra.mxu3 %v1366_v16 }
 0x198   :  { %1430 = vmatpush.msra.mxu2 %v1320_v47  ;;  %1392 = vmatpush.msra.mxu0 %v1252_v23  ;;  %v1287_v45 = vld [vmem:[#allocation7 + $0x128] sm:$0xff]  ;;  %v1364_v23 = vld [vmem:[#allocation7 + $0x390] sm:$0xff] }
 0x199   :  { %1412 = vmatpush.msra.mxu1 %v1284_v48  ;;  %v1321_v48 = vld [vmem:[#allocation7 + $0x238] sm:$0xff]  ;;  %1444 = vmatpush.msra.mxu3 %v1364_v23  ;;  %v1557_v23 = vld [vmem:[%s2003_s3 + $0x68] sm:$0xff] }
 0x19a   :  { %1431 = vmatpush.msra.mxu2 %v1318_v49  ;;  %1393 = vmatpush.msra.mxu0 %v1250_v46  ;;  %v1285_v49 = vld [vmem:[#allocation7 + $0x118] sm:$0xff]  ;;  %v1362_v46 = vld [vmem:[#allocation7 + $0x380] sm:$0xff] }
 0x19b   :  { %1413 = vmatpush.msra.mxu1 %v1282_v51  ;;  %1394 = vmatmul.f32.vlgmr.msra.gmra.mxu0 %v1893_v53  ;;  %v1251_v51 = vld [vmem:[#allocation7 + $0x8] sm:$0xff] }
 0x19c   :  { %1414 = vmatmul.f32.vlgmr.msra.gmra.mxu1 %v1896_v56  ;;  %1458 = vmatpush.msrb.mxu0 %v1281_v52 }
 0x19d   :  { %1478 = vmatpush.msrb.mxu1 %v1313_v54  ;;  %1432 = vmatpush.msra.mxu2 %v1316_v55  ;;  %v1319_v54 = vld [vmem:[#allocation7 + $0x228] sm:$0xff] }
 0x19e   :  { %1459 = vmatpush.msrb.mxu0 %v1279_v58  ;;  %v1283_v55 = vld [vmem:[#allocation7 + $0x108] sm:$0xff]  ;;  %1445 = vmatpush.msra.mxu3 %v1362_v46  ;;  %v1555_v46 = vld [vmem:[%s2003_s3 + $0x58] sm:$0xff] }
 0x19f   :  { %1479 = vmatpush.msrb.mxu1 %v1311_v59  ;;  %1433 = vmatpush.msra.mxu2 %v1314_v4  ;;  %v1317_v59 = vld [vmem:[#allocation7 + $0x218] sm:$0xff] }
 0x1a0   :  { %1460 = vmatpush.msrb.mxu0 %v1277_v62 }
 0x1a1   :  { %1498 = vmatpush.msrb.mxu2 %v1345_v60  ;;  %1480 = vmatpush.msrb.mxu1 %v1309_v61  ;;  %v1360_v60 = vld [vmem:[#allocation7 + $0x370] sm:$0xff]  ;;  %v1315_v61 = vld [vmem:[#allocation7 + $0x208] sm:$0xff] }
 0x1a2   :  { %1461 = vmatpush.msrb.mxu0 %v1275_v0  ;;  %1446 = vmatpush.msra.mxu3 %v1360_v60  ;;  %v1567_v60 = vld [vmem:[%s2003_s3 + $0xb8] sm:$0xff] }
 0x1a3   :  { %1499 = vmatpush.msrb.mxu2 %v1343_v1  ;;  %1481 = vmatpush.msrb.mxu1 %v1307_v2  ;;  %v1358_v1 = vld [vmem:[#allocation7 + $0x360] sm:$0xff] }
 0x1a4   :  { %1462 = vmatpush.msrb.mxu0 %v1273_v40  ;;  %1447 = vmatpush.msra.mxu3 %v1358_v1  ;;  %v1548_v1 = vld [vmem:[%s2003_s3 + $0x20] sm:$0xff] }
 0x1a5   :  { %1500 = vmatpush.msrb.mxu2 %v1341_v3  ;;  %1482 = vmatpush.msrb.mxu1 %v1305_v5  ;;  %v1356_v3 = vld [vmem:[#allocation7 + $0x350] sm:$0xff] }
 0x1a6   :  { %1463 = vmatpush.msrb.mxu0 %v1271_v35  ;;  %v1354_v35 = vld [vmem:[#allocation7 + $0x340] sm:$0xff]  ;;  %1448 = vmatpush.msra.mxu3 %v1356_v3  ;;  %v1566_v3 = vld [vmem:[%s2003_s3 + $0xb0] sm:$0xff] }
 0x1a7   :  { %1501 = vmatpush.msrb.mxu2 %v1339_v6  ;;  %1483 = vmatpush.msrb.mxu1 %v1303_v7  ;;  %v1352_v7 = vld [vmem:[#allocation7 + $0x330] sm:$0xff] }
 0x1a8   :  { %1464 = vmatpush.msrb.mxu0 %v1269_v10  ;;  %1449 = vmatpush.msra.mxu3 %v1354_v35  ;;  %v1377_v10 = vld [vmem:[#allocation7 + $0x3f8] sm:$0xff]  ;;  %v1565_v35 = vld [vmem:[%s2003_s3 + $0xa8] sm:$0xff] }
 0x1a9   :  { %1502 = vmatpush.msrb.mxu2 %v1337_v11  ;;  %1484 = vmatpush.msrb.mxu1 %v1301_v12  ;;  %v1375_v11 = vld [vmem:[#allocation7 + $0x3e8] sm:$0xff]  ;;  %v1373_v12 = vld [vmem:[#allocation7 + $0x3d8] sm:$0xff] }
 0x1aa   :  { %1465 = vmatpush.msrb.mxu0 %v1267_v15  ;;  %1450 = vmatpush.msra.mxu3 %v1352_v7  ;;  %v1371_v15 = vld [vmem:[#allocation7 + $0x3c8] sm:$0xff] }
 0x1ab   :  { %1503 = vmatpush.msrb.mxu2 %v1335_v17  ;;  %1485 = vmatpush.msrb.mxu1 %v1299_v20  ;;  %v1369_v17 = vld [vmem:[#allocation7 + $0x3b8] sm:$0xff]  ;;  %v1367_v20 = vld [vmem:[#allocation7 + $0x3a8] sm:$0xff] }
 0x1ac   :  { %1466 = vmatpush.msrb.mxu0 %v1265_v21  ;;  %v955_v37 = vpop.f32.mrf.mxu1  ;;  %v1365_v21 = vld [vmem:[#allocation7 + $0x398] sm:$0xff]  ;;  %v1564_v7 = vld [vmem:[%s2003_s3 + $0xa0] sm:$0xff] }
 0x1ad   :  { %1504 = vmatpush.msrb.mxu2 %v1333_v22  ;;  %1486 = vmatpush.msrb.mxu1 %v1297_v25  ;;  %v956_v32 = vadd.f32 %v955_v37, %v935_v29  ;;  %v1363_v22 = vld [vmem:[#allocation7 + $0x388] sm:$0xff]  ;;  %v1361_v25 = vld [vmem:[#allocation7 + $0x378] sm:$0xff] }
 0x1ae   :  { %1467 = vmatpush.msrb.mxu0 %v1263_v26  ;;  %v1015_v50 = vpop.f32.mrf.mxu0  ;;  %v1359_v26 = vld [vmem:[#allocation7 + $0x368] sm:$0xff] }
 0x1af   :  { %1505 = vmatpush.msrb.mxu2 %v1331_v27  ;;  %1487 = vmatpush.msrb.mxu1 %v1295_v57  ;;  %v976_v18 = vadd.f32 %v975_v9, %v956_v32  ;;  %v1357_v27 = vld [vmem:[#allocation7 + $0x358] sm:$0xff]  ;;  %v1351_v29 = vld [vmem:[#allocation7 + $0x328] sm:$0xff] }
 0x1b0   :  { %1468 = vmatpush.msrb.mxu0 %v1261_v31  ;;  %v1353_v57 = vld [vmem:[#allocation7 + $0x338] sm:$0xff]  ;;  %v1347_v31 = vld [vmem:[#allocation7 + $0x308] sm:$0xff] }
 0x1b1   :  { %1506 = vmatpush.msrb.mxu2 %v1329_v63  ;;  %1488 = vmatpush.msrb.mxu1 %v1293_v33  ;;  %v996_v47 = vadd.f32 %v995_v41, %v976_v18 }
 0x1b2   :  { %1469 = vmatpush.msrb.mxu0 %v1259_v36 }
 0x1b3   :  { %1507 = vmatpush.msrb.mxu2 %v1327_v38  ;;  %1489 = vmatpush.msrb.mxu1 %v1291_v39  ;;  %v1016_v52 = vadd.f32 %v1015_v50, %v996_v47  ;;  %v1575_v47 = vld [vmem:[%s2003_s3 + $0xf8] sm:$0xff]  ;;  %v1572_v50 = vld [vmem:[%s2003_s3 + $0xe0] sm:$0xff] }
 0x1b4   :  { %1470 = vmatpush.msrb.mxu0 %v1257_v42 }
 0x1b5   :  { %1508 = vmatpush.msrb.mxu2 %v1325_v43  ;;  %1490 = vmatpush.msrb.mxu1 %v1289_v14  ;;  %v1035_v58 = vpop.f32.mrf.mxu1 }
 0x1b6   :  { %1471 = vmatpush.msrb.mxu0 %v1255_v19  ;;  %v1036_v4 = vadd.f32 %v1035_v58, %v1016_v52  ;;  %v1055_v62 = vpop.f32.mrf.mxu2  ;;  %v1554_v52 = vld [vmem:[%s2003_s3 + $0x50] sm:$0xff]  ;;  %v1569_v58 = vld [vmem:[%s2003_s3 + $0xc8] sm:$0xff] }
 0x1b7   :  { %1509 = vmatpush.msrb.mxu2 %v1323_v44  ;;  %1491 = vmatpush.msrb.mxu1 %v1287_v45  ;;  %v1559_v44 = vld [vmem:[%s2003_s3 + $0x78] sm:$0xff]  ;;  %v1558_v45 = vld [vmem:[%s2003_s3 + $0x70] sm:$0xff] }
 0x1b8   :  { %1472 = vmatpush.msrb.mxu0 %v1253_v24  ;;  %v1056_v0 = vadd.f32 %v1055_v62, %v1036_v4  ;;  %v1574_v24 = vld [vmem:[%s2003_s3 + $0xf0] sm:$0xff]  ;;  %v1568_v4 = vld [vmem:[%s2003_s3 + $0xc0] sm:$0xff]  ;;  %v1551_v62 = vld [vmem:[%s2003_s3 + $0x38] sm:$0xff] }
 0x1b9   :  { %1510 = vmatpush.msrb.mxu2 %v1321_v48  ;;  %1492 = vmatpush.msrb.mxu1 %v1285_v49  ;;  %v1075_v2 = vpop.f32.mrf.mxu3  ;;  %v1573_v48 = vld [vmem:[%s2003_s3 + $0xe8] sm:$0xff]  ;;  %v1556_v49 = vld [vmem:[%s2003_s3 + $0x60] sm:$0xff] }
 0x1ba   :  { %1473 = vmatpush.msrb.mxu0 %v1251_v51  ;;  %v1076_v40 = vadd.f32 %v1075_v2, %v1056_v0  ;;  %v1571_v51 = vld [vmem:[%s2003_s3 + $0xd8] sm:$0xff]  ;;  %v1549_v0 = vld [vmem:[%s2003_s3 + $0x28] sm:$0xff] }
 0x1bb   :  { %1511 = vmatpush.msrb.mxu2 %v1319_v54  ;;  %1493 = vmatpush.msrb.mxu1 %v1283_v55  ;;  %v1570_v54 = vld [vmem:[%s2003_s3 + $0xd0] sm:$0xff]  ;;  %v1553_v55 = vld [vmem:[%s2003_s3 + $0x48] sm:$0xff]  ;;  %v1547_v2 = vld [vmem:[%s2003_s3 + $0x18] sm:$0xff] }
 0x1bc   :  { %1474 = vmatmul.f32.vlgmr.msrb.gmra.mxu0 %v1893_v53  ;;  %1494 = vmatmul.f32.vlgmr.msrb.gmra.mxu1 %v1896_v56  ;;  %vm1240_vm2 = vcmp.ge.f32.partialorder %v1076_v40, 0.0  ;;  %v1244_v5 = vmul.f32 0.2, %v1076_v40  ;;  %v1350_v53 = vld [vmem:[#allocation7 + $0x320] sm:$0xff]  ;;  %v1348_v56 = vld [vmem:[#allocation7 + $0x310] sm:$0xff] }
 0x1bd   :  { %1512 = vmatpush.msrb.mxu2 %v1317_v59  ;;  %1451 = vmatpush.msra.mxu3 %v1350_v53  ;;  %v1552_v59 = vld [vmem:[%s2003_s3 + $0x40] sm:$0xff]  ;;  %v1563_v53 = vld [vmem:[%s2003_s3 + $0x98] sm:$0xff] }
 0x1be   :  { %v1248_v6 = vsel %vm1240_vm2, %v1076_v40, %v1244_v5  ;;  %1576 = vmatpush.msra.mxu0 %v1559_v44  ;;  %1596 = vmatpush.msra.mxu1 %v1575_v47  ;;  %v1546_v40 = vld [vmem:[%s2003_s3 + $0x10] sm:$0xff]  ;;  %v1545_v5 = vld [vmem:[%s2003_s3 + $0x8] sm:$0xff] }
 0x1bf   :  { %1513 = vmatpush.msrb.mxu2 %v1315_v61  ;;  %1452 = vmatpush.msra.mxu3 %v1348_v56  ;;  %v1550_v61 = vld [vmem:[%s2003_s3 + $0x30] sm:$0xff] }
 0x1c0   :  { %1434 = vmatmul.f32.vlgmr.msra.gmra.mxu2 %v1248_v6  ;;  %1577 = vmatpush.msra.mxu0 %v1558_v45  ;;  %v1562_v56 = vld [vmem:[%s2003_s3 + $0x90] sm:$0xff] }
 0x1c1   :  { %1453 = vmatpush.msra.mxu3 %v1346_v8  ;;  %1597 = vmatpush.msra.mxu1 %v1574_v24  ;;  %v1561_v8 = vld [vmem:[%s2003_s3 + $0x88] sm:$0xff] }
 0x1c2   :  { %1578 = vmatpush.msra.mxu0 %v1557_v23 }
 0x1c3   :  { %1518 = vmatpush.msrb.mxu3 %v1377_v10  ;;  %1598 = vmatpush.msra.mxu1 %v1573_v48  ;;  %v1560_v10 = vld [vmem:[%s2003_s3 + $0x80] sm:$0xff] }
 0x1c4   :  { %1579 = vmatpush.msra.mxu0 %v1556_v49 }
 0x1c5   :  { %1519 = vmatpush.msrb.mxu3 %v1375_v11  ;;  %1599 = vmatpush.msra.mxu1 %v1572_v50 }
 0x1c6   :  { %1580 = vmatpush.msra.mxu0 %v1555_v46 }
 0x1c7   :  { %1520 = vmatpush.msrb.mxu3 %v1373_v12  ;;  %1600 = vmatpush.msra.mxu1 %v1571_v51 }
 0x1c8   :  { %1514 = vmatmul.f32.vlgmr.msrb.gmra.mxu2 %v1248_v6  ;;  %1581 = vmatpush.msra.mxu0 %v1554_v52  ;;  %v1544_v6 = vld [vmem:[%s2003_s3] sm:$0xff]  ;;  %s1770_s3 = smov [#allocation8]  }
 0x1c9   :  { %1521 = vmatpush.msrb.mxu3 %v1371_v15  ;;  %1601 = vmatpush.msra.mxu1 %v1570_v54  ;;  %s1632_s11 = sshll.u32 %s1770_s3, 4  ;;  %s1633_s11 = int_to_ptr.vmem [resolvable:$true] %s1632_s11 }
 0x1ca   :  { %1582 = vmatpush.msra.mxu0 %v1553_v55 }
 0x1cb   :  { %1522 = vmatpush.msrb.mxu3 %v1369_v17  ;;  %1602 = vmatpush.msra.mxu1 %v1569_v58 }
 0x1cc   :  { %1583 = vmatpush.msra.mxu0 %v1552_v59 }
 0x1cd   :  { %1523 = vmatpush.msrb.mxu3 %v1367_v20  ;;  %1603 = vmatpush.msra.mxu1 %v1568_v4 }
 0x1ce   :  { %1584 = vmatpush.msra.mxu0 %v1551_v62 }
 0x1cf   :  { %1524 = vmatpush.msrb.mxu3 %v1365_v21  ;;  %1604 = vmatpush.msra.mxu1 %v1567_v60 }
 0x1d0   :  { %1585 = vmatpush.msra.mxu0 %v1550_v61 }
 0x1d1   :  { %1525 = vmatpush.msrb.mxu3 %v1363_v22  ;;  %1605 = vmatpush.msra.mxu1 %v1566_v3 }
 0x1d2   :  { %1586 = vmatpush.msra.mxu0 %v1549_v0 }
 0x1d3   :  { %1526 = vmatpush.msrb.mxu3 %v1361_v25  ;;  %1606 = vmatpush.msra.mxu1 %v1565_v35 }
 0x1d4   :  { %1587 = vmatpush.msra.mxu0 %v1548_v1 }
 0x1d5   :  { %1527 = vmatpush.msrb.mxu3 %v1359_v26  ;;  %1607 = vmatpush.msra.mxu1 %v1564_v7 }
 0x1d6   :  { %1588 = vmatpush.msra.mxu0 %v1547_v2 }
 0x1d7   :  { %1528 = vmatpush.msrb.mxu3 %v1357_v27  ;;  %1608 = vmatpush.msra.mxu1 %v1563_v53 }
 0x1d8   :  { %1589 = vmatpush.msra.mxu0 %v1546_v40 }
 0x1d9   :  { %1529 = vmatpush.msrb.mxu3 %v1355_v28  ;;  %1609 = vmatpush.msra.mxu1 %v1562_v56 }
 0x1da   :  { %1590 = vmatpush.msra.mxu0 %v1545_v5 }
 0x1db   :  { %1530 = vmatpush.msrb.mxu3 %v1353_v57  ;;  %1610 = vmatpush.msra.mxu1 %v1561_v8 }
 0x1dc   :  { %1591 = vmatpush.msra.mxu0 %v1544_v6 }
 0x1dd   :  { %1531 = vmatpush.msrb.mxu3 %v1351_v29  ;;  %1611 = vmatpush.msra.mxu1 %v1560_v10 }
 0x1df   :  { %1532 = vmatpush.msrb.mxu3 %v1349_v30 }
 0x1e1   :  { %1533 = vmatpush.msrb.mxu3 %v1347_v31 }
 0x1ea   :  { %v1095_v63 = vpop.f32.mrf.mxu0 }
 0x1ec   :  { %v1115_v33 = vpop.f32.mrf.mxu1 }
 0x1ed   :  { %v1116_v34 = vadd.f32 %v1115_v33, %v1095_v63  ;;  %v1135_v36 = vpop.f32.mrf.mxu2 }
 0x1ef   :  { %v1136_v37 = vadd.f32 %v1135_v36, %v1116_v34 }
 0x1f0   :  { %v1155_v38 = vpop.f32.mrf.mxu3 }
 0x1f1   :  { %v1156_v39 = vadd.f32 %v1155_v38, %v1136_v37 }
 0x1f7   :  { %v1175_v32 = vpop.f32.mrf.mxu0 }
 0x1f8   :  { %v1176_v9 = vadd.f32 %v1175_v32, %v1156_v39 }
 0x1fb   :  { %v1195_v13 = vpop.f32.mrf.mxu1 }
 0x1fc   :  { %v1196_v42 = vadd.f32 %v1195_v13, %v1176_v9 }
 0x1ff   :  { %v1215_v43 = vpop.f32.mrf.mxu2 }
 0x200   :  { %v1216_v14 = vadd.f32 %v1215_v43, %v1196_v42 }
 0x202   :  { %v1235_v18 = vpop.f32.mrf.mxu3 }
 0x203   :  { %v1236_v16 = vadd.f32 %v1235_v18, %v1216_v14 }
 0x205   :  { %vm1241_vm3 = vcmp.ge.f32.partialorder %v1236_v16, 0.0  ;;  %v1245_v19 = vmul.f32 0.2, %v1236_v16 }
 0x207   :  { %v1249_v41 = vsel %vm1241_vm3, %v1236_v16, %v1245_v19 }
 0x208   :  { %1454 = vmatmul.f32.vlgmr.msra.gmra.mxu3 %v1249_v41 }
 0x210   :  { %1534 = vmatmul.f32.vlgmr.msrb.gmra.mxu3 %v1249_v41 }
 0x218   :  { %v1395_v11 = vpop.f32.mrf.mxu0 }
 0x219   :  { %v1415_v12 = vpop.f32.mrf.mxu1 }
 0x21a   :  { %v1416_v17 = vadd.f32 %v1415_v12, %v1395_v11 }
 0x239   :  { %v1475_v25 = vpop.f32.mrf.mxu0  ;;  %v1495_v26 = vpop.f32.mrf.mxu1 }
 0x23a   :  { %v1496_v57 = vadd.f32 %v1495_v26, %v1475_v25 }
 0x243   :  { %v1435_v15 = vpop.f32.mrf.mxu2 }
 0x244   :  { %v1436_v20 = vadd.f32 %v1435_v15, %v1416_v17 }
 0x24b   :  { %v1515_v28 = vpop.f32.mrf.mxu2 }
 0x24c   :  { %v1516_v30 = vadd.f32 %v1515_v28, %v1496_v57 }
 0x28b   :  { %v1455_v21 = vpop.f32.mrf.mxu3 }
 0x28c   :  { %v1456_v22 = vadd.f32 %v1455_v21, %v1436_v20 }
 0x28e   :  { %vm1538_vm4 = vcmp.ge.f32.partialorder %v1456_v22, 0.0  ;;  %v1540_v27 = vmul.f32 0.2, %v1456_v22 }
 0x290   :  { %v1542_v29 = vsel %vm1538_vm4, %v1456_v22, %v1540_v27 }
 0x291   :  { %1592 = vmatmul.f32.vlgmr.msra.gmra.mxu0 %v1542_v29 }
 0x293   :  { %v1535_v31 = vpop.f32.mrf.mxu3 }
 0x294   :  { %v1536_v63 = vadd.f32 %v1535_v31, %v1516_v30 }
 0x296   :  { %vm1539_vm5 = vcmp.ge.f32.partialorder %v1536_v63, 0.0  ;;  %v1541_v33 = vmul.f32 0.2, %v1536_v63 }
 0x298   :  { %v1543_v34 = vsel %vm1539_vm5, %v1536_v63, %v1541_v33 }
 0x299   :  { %1612 = vmatmul.f32.vlgmr.msra.gmra.mxu1 %v1543_v34 }
 0x30e   :  { %v1593_v36 = vpop.f32.mrf.mxu0 }
 0x316   :  { %v1613_v37 = vpop.f32.mrf.mxu1 }
 0x317   :  { %v1614_v38 = vadd.f32 %v1613_v37, %v1593_v36 }
 0x319   :  { %v1617_v39 = vsel %vm1616_vm6, %v1614_v38, 0.0 }
 0x31a   :  { %v1618_v32 = vrot.slane %v1617_v39, 4 }
 0x31c   :  { %v1619_v9 = vadd.f32 %v1618_v32, %v1617_v39 }
 0x31e   :  { %v1620_v13 = vrot.slane %v1619_v9, 2 }
 0x320   :  { %v1621_v42 = vadd.f32 %v1620_v13, %v1619_v9 }
 0x322   :  { %v1622_v43 = vrot.slane %v1621_v42, 1 }
 0x324   :  { %v1623_v14 = vadd.f32 %v1622_v43, %v1621_v42 }
 0x326   :  { %v1624_v18 = vmul.f32 0.5, %v1623_v14 }
 0x328   :  { %1626 = vst.msk [vmem:[#allocation8] sm:$0x1] %vm1625_vm7, %v1624_v18 }
 0x329   :  { %1637 = dma.vmem_to_hbm [thread:$0]  %s1633_s11, 16, %s1635_s14, [#allocation4]  }
 0x32a   :  { %1761 = dma.done.wait [#allocation4], 16  }
 0x32b   :  { %1762 = vsyncadd [#allocation4], 4294967280 }
 0x32c   :  { %1642 = vsyncpa [#allocation3], 1 }
 0x32d   :  { %1643 = vsyncpa [#allocation6], 1 }
 0x32e   :  { %1644 = vsyncpa [#allocation4], 1 }

</bundles_post_ra>
